<compile_context>
chip_gen: v7x
topology: tpu7x:2x2x1
jax: 0.10.0
libtpu: 0.0.40
codegen_flags: <defaults>
</compile_context>

<pallas_src>
import jax
import jax.numpy as jnp
from jax import lax
from jax.experimental import pallas as pl
from jax.experimental.pallas import tpu as pltpu

# ----------------------------------------------------------------------------
# Config (mirrors model_config.dil_conv / model_config.rnn)
# ----------------------------------------------------------------------------
IN_DIM = 4          # dil_conv.in_dim
KERNEL_SIZE = 3     # dil_conv.kernel_size
N_CONVS = 2         # dil_conv.n_convs      (conv_type = 'glu')
H_UNITS = 32        # rnn.h_units           (rnn_type='gru', n_layers=1, bidir=0)
OUT_DIM = 8         # rnn.out_dim           (model_arch = 'rnn' -> non-AR branch)
B = 2               # batch
T = 16              # sequence length

REC_FIELD = KERNEL_SIZE ** N_CONVS                  # 9
PAD = (REC_FIELD - 1) // 2                          # 4
MID_DIM = IN_DIM * KERNEL_SIZE                      # 12 (after conv layer 0)
CONV_OUT_DIM = IN_DIM * KERNEL_SIZE ** N_CONVS      # 36 (after conv layer 1)

# ----------------------------------------------------------------------------
# Packed parameter slab layout: one (208, 96) f32 buffer, 8-row aligned blocks
# ----------------------------------------------------------------------------
P_COLS = 96
OFF_W0,  ROWS_W0  = 0,   KERNEL_SIZE * IN_DIM          # (12, 24)  glu0 tap-combined
OFF_W1,  ROWS_W1  = 16,  KERNEL_SIZE * MID_DIM         # (36, 72)  glu1 tap-combined
OFF_WIH, ROWS_WIH = 56,  CONV_OUT_DIM                  # (36, 96)  GRU W_ih
OFF_WHH, ROWS_WHH = 96,  H_UNITS                       # (32, 96)  GRU W_hh (all gates)
OFF_WHD, ROWS_WHD = 128, H_UNITS + CONV_OUT_DIM        # (68,  8)  folded head weight
OFF_BIAS          = 200                                # 5 bias rows (8-row block)
P_ROWS            = 208


def _full_spec(shape):
    """BlockSpec covering the whole array (single grid step)."""
    nd = len(shape)
    return pl.BlockSpec(shape, lambda *_args, _nd=nd: (0,) * _nd)


# ----------------------------------------------------------------------------
# Fused ConvRNN kernel: pad -> GLU x2 -> GRU -> folded head, all in VMEM/vregs
# Everything is time-major-interleaved: row index = t * B + b.
# ----------------------------------------------------------------------------
def _conv_rnn_kernel(x_ref, p_ref, o_ref):
    f32 = jnp.float32
    H = H_UNITS

    # ---- unpack parameters (static slices of the single packed slab) ------
    w0 = p_ref[OFF_W0:OFF_W0 + ROWS_W0, :2 * MID_DIM]            # (12, 24)
    w1 = p_ref[OFF_W1:OFF_W1 + ROWS_W1, :2 * CONV_OUT_DIM]       # (36, 72)
    wih = p_ref[OFF_WIH:OFF_WIH + ROWS_WIH, :]                   # (36, 96)
    whh = p_ref[OFF_WHH:OFF_WHH + ROWS_WHH, :]                   # (32, 96)
    w_head = p_ref[OFF_WHD:OFF_WHD + ROWS_WHD, :OUT_DIM]         # (68, 8)
    bias = p_ref[OFF_BIAS:OFF_BIAS + 8, :]                       # (8, 96)
    b0 = bias[0:1, :2 * MID_DIM]                                 # (1, 24)
    b1 = bias[1:2, :2 * CONV_OUT_DIM]                            # (1, 72)
    bih = bias[2:3, :3 * H]                                      # (1, 96) r/z hid-bias folded
    bhh_n = bias[3:4, :H]                                        # (1, 32)
    b_head = bias[4:5, :OUT_DIM]                                 # (1, 8)

    # ---- dilated GLU conv stack, both batches fused (interleaved rows) ----
    zpad = jnp.zeros((PAD * B, IN_DIM), f32)
    h = jnp.concatenate([zpad, x_ref[...], zpad], axis=0)        # (B*(T+2P), 4) = (48, 4)

    def glu(h_in, w, bvec, dilation, cout):
        rows_out = h_in.shape[0] - (KERNEL_SIZE - 1) * dilation * B
        taps = [h_in[k * dilation * B: k * dilation * B + rows_out, :]
                for k in range(KERNEL_SIZE)]
        slab = jnp.concatenate(taps, axis=1)                     # (rows_out, K*cin)
        acc = jnp.dot(slab, w, preferred_element_type=f32) + bvec
        return acc[:, :cout] * jax.nn.sigmoid(acc[:, cout:])

    h = glu(h, w0, b0, 1, MID_DIM)                               # (44, 12)
    conv_tm = glu(h, w1, b1, KERNEL_SIZE, CONV_OUT_DIM)          # (32, 36) time-major

    # ---- GRU: input->hidden projection hoisted out of the recurrence ------
    gi = jnp.dot(conv_tm, wih, preferred_element_type=f32) + bih  # (32, 96)

    h_state = jnp.zeros((B, H), f32)                 # carried in vregs
    hs = []
    for t in range(T):                               # fully unrolled (T static)
        gi_t = gi[B * t:B * t + B, :]                # contiguous (B, 3H) slice
        gh = jnp.dot(h_state, whh, preferred_element_type=f32)   # one fused matmul
        rz = jax.nn.sigmoid(gi_t[:, :2 * H] + gh[:, :2 * H])
        r = rz[:, :H]
        z = rz[:, H:]
        n = jnp.tanh(gi_t[:, 2 * H:] + r * (gh[:, 2 * H:] + bhh_n))
        h_state = (1.0 - z) * n + z * h_state
        hs.append(h_state)                           # stashed in vregs, no VMEM store
    rnn_tm = jnp.concatenate(hs, axis=0)             # (32, 32) time-major

    # ---- head: [rnn | conv_out] @ W_head  (both 1x1 convs folded) ---------
    head_in = jnp.concatenate([rnn_tm, conv_tm], axis=1)          # (32, 68)
    o_ref[...] = (jnp.dot(head_in, w_head, preferred_element_type=f32)
                  + b_head)                                       # single store


@jax.jit
def conv_rnn_forward(x, slab):
    # Wrapper-side layout plumbing only: present the kernel a time-major slab.
    x_tm = jnp.transpose(x, (1, 0, 2)).reshape(T * B, IN_DIM)
    y_tm = pl.pallas_call(
        _conv_rnn_kernel,
        out_shape=jax.ShapeDtypeStruct((T * B, OUT_DIM), jnp.float32),
        grid=(1,),
        in_specs=[_full_spec((T * B, IN_DIM)), _full_spec((P_ROWS, P_COLS))],
        out_specs=_full_spec((T * B, OUT_DIM)),
        compiler_params=pltpu.CompilerParams(dimension_semantics=("arbitrary",)),
    )(x_tm, slab)
    return jnp.transpose(y_tm.reshape(T, B, OUT_DIM), (1, 0, 2))


# ----------------------------------------------------------------------------
# Parameters (deterministic synthetic init; shapes follow the module __init__)
# ----------------------------------------------------------------------------
def init_params(key):
    ks = jax.random.split(key, 12)
    p = {}
    cin = IN_DIM
    for i in range(N_CONVS):
        cout = IN_DIM * KERNEL_SIZE ** (i + 1)
        p[f'glu{i}_w'] = 0.2 * jax.random.normal(
            ks[2 * i], (KERNEL_SIZE, cin, 2 * cout), jnp.float32)
        p[f'glu{i}_b'] = 0.1 * jax.random.normal(
            ks[2 * i + 1], (1, 2 * cout), jnp.float32)
        cin = cout
    p['gru_wih'] = 0.2 * jax.random.normal(ks[4], (CONV_OUT_DIM, 3 * H_UNITS),
                                           jnp.float32)
    p['gru_whh'] = 0.2 * jax.random.normal(ks[5], (H_UNITS, 3 * H_UNITS),
                                           jnp.float32)
    p['gru_bih'] = 0.1 * jax.random.normal(ks[6], (1, 3 * H_UNITS), jnp.float32)
    p['gru_bhh'] = 0.1 * jax.random.normal(ks[7], (1, 3 * H_UNITS), jnp.float32)
    p['conv_w'] = 0.2 * jax.random.normal(ks[8], (H_UNITS, OUT_DIM), jnp.float32)
    p['conv_b'] = 0.1 * jax.random.normal(ks[9], (1, OUT_DIM), jnp.float32)
    p['conv2_w'] = 0.2 * jax.random.normal(
        ks[10], (OUT_DIM + CONV_OUT_DIM, OUT_DIM), jnp.float32)
    p['conv2_b'] = 0.1 * jax.random.normal(ks[11], (1, OUT_DIM), jnp.float32)
    return p


def prepare_params(p):
    """Fold biases / head weights and pack everything into one f32 slab."""
    H, O = H_UNITS, OUT_DIM
    # Tap-combined conv weights: (K, cin, 2*cout) -> (K*cin, 2*cout).
    w0c = p['glu0_w'].reshape(KERNEL_SIZE * IN_DIM, 2 * MID_DIM)
    w1c = p['glu1_w'].reshape(KERNEL_SIZE * MID_DIM, 2 * CONV_OUT_DIM)
    # Fold r/z hidden biases (plain adds) into the input bias; keep b_hn apart.
    bih_f = p['gru_bih'] + jnp.concatenate(
        [p['gru_bhh'][:, :2 * H], jnp.zeros((1, H), jnp.float32)], axis=1)
    bhh_n = p['gru_bhh'][:, 2 * H:]
    # Fold the first 1x1 conv into the second (head folding).
    w2a = p['conv2_w'][:O]                                 # acts on the 1x1-conv output
    w2b = p['conv2_w'][O:]                                 # acts on conv_out
    w_head = jnp.concatenate([p['conv_w'] @ w2a, w2b], axis=0)   # (H + C, O)
    b_head = p['conv_b'] @ w2a + p['conv2_b']                    # (1, O)

    slab = jnp.zeros((P_ROWS, P_COLS), jnp.float32)

    def put(s, row, a):
        return s.at[row:row + a.shape[0], :a.shape[1]].set(a)

    slab = put(slab, OFF_W0, w0c)
    slab = put(slab, OFF_W1, w1c)
    slab = put(slab, OFF_WIH, p['gru_wih'])
    slab = put(slab, OFF_WHH, p['gru_whh'])
    slab = put(slab, OFF_WHD, w_head)
    slab = put(slab, OFF_BIAS + 0, p['glu0_b'])
    slab = put(slab, OFF_BIAS + 1, p['glu1_b'])
    slab = put(slab, OFF_BIAS + 2, bih_f)
    slab = put(slab, OFF_BIAS + 3, bhh_n)
    slab = put(slab, OFF_BIAS + 4, b_head)
    return slab


# ----------------------------------------------------------------------------
# Pure-JAX reference (same math, no Pallas, unfolded weights) for correctness
# ----------------------------------------------------------------------------
def conv_rnn_reference(x, p):
    h = jnp.pad(x, ((0, 0), (PAD, PAD), (0, 0)))
    for i in range(N_CONVS):
        cout = IN_DIM * KERNEL_SIZE ** (i + 1)
        d = KERNEL_SIZE ** i
        t_out = h.shape[1] - (KERNEL_SIZE - 1) * d
        acc = jnp.zeros((h.shape[0], t_out, 2 * cout), jnp.float32)
        for tap in range(KERNEL_SIZE):
            acc = acc + jnp.einsum('btc,cd->btd',
                                   h[:, tap * d: tap * d + t_out, :],
                                   p[f'glu{i}_w'][tap])
        acc = acc + p[f'glu{i}_b'][None]
        h = acc[..., :cout] * jax.nn.sigmoid(acc[..., cout:])
    conv_out = h
    hn = H_UNITS

    def step(hst, x_t):
        gi = x_t @ p['gru_wih'] + p['gru_bih']
        gh = hst @ p['gru_whh'] + p['gru_bhh']
        r = jax.nn.sigmoid(gi[:, :hn] + gh[:, :hn])
        z = jax.nn.sigmoid(gi[:, hn:2 * hn] + gh[:, hn:2 * hn])
        n = jnp.tanh(gi[:, 2 * hn:] + r * gh[:, 2 * hn:])
        h_new = (1.0 - z) * n + z * hst
        return h_new, h_new

    x_tbc = jnp.transpose(conv_out, (1, 0, 2))
    _, outs = lax.scan(step, jnp.zeros((x.shape[0], hn), jnp.float32), x_tbc)
    rnn_btc = jnp.transpose(outs, (1, 0, 2))
    y1 = rnn_btc @ p['conv_w'] + p['conv_b'][None]
    cat = jnp.concatenate([y1, conv_out], axis=-1)
    return cat @ p['conv2_w'] + p['conv2_b'][None]


if __name__ == "__main__":
    key = jax.random.PRNGKey(0)
    pkey, xkey = jax.random.split(key)
    params = init_params(pkey)
    x = jax.random.normal(xkey, (B, T, IN_DIM), jnp.float32)
    slab = prepare_params(params)

    y = conv_rnn_forward(x, slab)
    y = jax.block_until_ready(y)

    y_ref = conv_rnn_reference(x, params)
    assert y.shape == (B, T, OUT_DIM), y.shape
    err = float(jnp.max(jnp.abs(y - y_ref)))
    assert err < 1e-4, f"mismatch vs reference: {err}"
    # TODO(synk): Dropout(p=0.5) layers are identity in eval mode; training-mode
    # dropout (pltpu.prng_*) is intentionally not implemented.
    print("KERNEL_OK")
</pallas_src>

<mosaic_0001>
module attributes {stable_mosaic.version = 11 : i64} {
  func.func @_conv_rnn_kernel(%arg0: i32, %arg1: memref<32x4xf32, #tpu.memory_space<vmem>>, %arg2: memref<208x96xf32, #tpu.memory_space<vmem>>, %arg3: memref<32x8xf32, #tpu.memory_space<vmem>>) attributes {dimension_semantics = [#tpu.dimension_semantics<arbitrary>], iteration_bounds = array<i64: 1>, scalar_prefetch = 0 : i64, scratch_operands = 0 : i64, tpu.core_type = #tpu.core_type<tc>, window_params = [{pipeline_mode = #tpu.pipeline_mode<synchronous>, transform_indices = @transform_0, window_bounds = array<i64: 32, 4>}, {pipeline_mode = #tpu.pipeline_mode<synchronous>, transform_indices = @transform_1, window_bounds = array<i64: 208, 96>}, {pipeline_mode = #tpu.pipeline_mode<synchronous>, transform_indices = @transform_2, window_bounds = array<i64: 32, 8>}]} {
    %c0 = arith.constant 0 : index
    %c0_0 = arith.constant 0 : index
    %0 = vector.load %arg2[%c0, %c0_0] : memref<208x96xf32, #tpu.memory_space<vmem>>, vector<12x24xf32>
    %c16 = arith.constant 16 : index
    %c0_1 = arith.constant 0 : index
    %1 = vector.load %arg2[%c16, %c0_1] : memref<208x96xf32, #tpu.memory_space<vmem>>, vector<36x72xf32>
    %c56 = arith.constant 56 : index
    %c0_2 = arith.constant 0 : index
    %2 = vector.load %arg2[%c56, %c0_2] : memref<208x96xf32, #tpu.memory_space<vmem>>, vector<36x96xf32>
    %c96 = arith.constant 96 : index
    %c0_3 = arith.constant 0 : index
    %3 = vector.load %arg2[%c96, %c0_3] : memref<208x96xf32, #tpu.memory_space<vmem>>, vector<32x96xf32>
    %c128 = arith.constant 128 : index
    %c0_4 = arith.constant 0 : index
    %4 = vector.load %arg2[%c128, %c0_4] : memref<208x96xf32, #tpu.memory_space<vmem>>, vector<68x8xf32>
    %c200 = arith.constant 200 : index
    %c0_5 = arith.constant 0 : index
    %5 = vector.load %arg2[%c200, %c0_5] : memref<208x96xf32, #tpu.memory_space<vmem>>, vector<8x96xf32>
    %6 = vector.extract_strided_slice %5 {offsets = [0, 0], sizes = [1, 24], strides = [1, 1]} : vector<8x96xf32> to vector<1x24xf32>
    %7 = vector.extract_strided_slice %5 {offsets = [1, 0], sizes = [1, 72], strides = [1, 1]} : vector<8x96xf32> to vector<1x72xf32>
    %8 = vector.extract_strided_slice %5 {offsets = [2, 0], sizes = [1, 96], strides = [1, 1]} : vector<8x96xf32> to vector<1x96xf32>
    %9 = vector.extract_strided_slice %5 {offsets = [3, 0], sizes = [1, 32], strides = [1, 1]} : vector<8x96xf32> to vector<1x32xf32>
    %10 = vector.extract_strided_slice %5 {offsets = [4, 0], sizes = [1, 8], strides = [1, 1]} : vector<8x96xf32> to vector<1x8xf32>
    %cst = arith.constant 0.000000e+00 : f32
    %11 = vector.broadcast %cst : f32 to vector<8x4xf32>
    %c0_6 = arith.constant 0 : index
    %c0_7 = arith.constant 0 : index
    %12 = vector.load %arg1[%c0_6, %c0_7] : memref<32x4xf32, #tpu.memory_space<vmem>>, vector<32x4xf32>
    %13 = tpu.concatenate %11, %12, %11 in 0 : vector<8x4xf32>, vector<32x4xf32>, vector<8x4xf32> -> vector<48x4xf32>
    %14 = vector.extract_strided_slice %13 {offsets = [0, 0], sizes = [44, 4], strides = [1, 1]} : vector<48x4xf32> to vector<44x4xf32>
    %15 = vector.extract_strided_slice %13 {offsets = [2, 0], sizes = [44, 4], strides = [1, 1]} : vector<48x4xf32> to vector<44x4xf32>
    %16 = vector.extract_strided_slice %13 {offsets = [4, 0], sizes = [44, 4], strides = [1, 1]} : vector<48x4xf32> to vector<44x4xf32>
    %17 = tpu.concatenate %14, %15, %16 in 1 : vector<44x4xf32>, vector<44x4xf32>, vector<44x4xf32> -> vector<44x12xf32>
    %cst_8 = arith.constant dense<0.000000e+00> : vector<44x24xf32>
    %18 = tpu.matmul %17, %0, %cst_8 {dimension_numbers = #tpu.dot_dimension_numbers<[1], [0], [0], [1], [0, 0, 1, 1], [], []>} : vector<44x12xf32>, vector<12x24xf32>, vector<44x24xf32> -> vector<44x24xf32>
    %19 = vector.broadcast %6 : vector<1x24xf32> to vector<44x24xf32>
    %20 = arith.addf %18, %19 : vector<44x24xf32>
    %21 = vector.extract_strided_slice %20 {offsets = [0, 0], sizes = [44, 12], strides = [1, 1]} : vector<44x24xf32> to vector<44x12xf32>
    %22 = vector.extract_strided_slice %20 {offsets = [0, 12], sizes = [44, 12], strides = [1, 1]} : vector<44x24xf32> to vector<44x12xf32>
    %23 = arith.negf %22 : vector<44x12xf32>
    %24 = math.exp %23 : vector<44x12xf32>
    %cst_9 = arith.constant 1.000000e+00 : f32
    %25 = vector.broadcast %cst_9 : f32 to vector<44x12xf32>
    %26 = arith.addf %25, %24 : vector<44x12xf32>
    %27 = arith.divf %25, %26 : vector<44x12xf32>
    %28 = arith.mulf %21, %27 : vector<44x12xf32>
    %29 = vector.extract_strided_slice %28 {offsets = [0, 0], sizes = [32, 12], strides = [1, 1]} : vector<44x12xf32> to vector<32x12xf32>
    %30 = vector.extract_strided_slice %28 {offsets = [6, 0], sizes = [32, 12], strides = [1, 1]} : vector<44x12xf32> to vector<32x12xf32>
    %31 = vector.extract_strided_slice %28 {offsets = [12, 0], sizes = [32, 12], strides = [1, 1]} : vector<44x12xf32> to vector<32x12xf32>
    %32 = tpu.concatenate %29, %30, %31 in 1 : vector<32x12xf32>, vector<32x12xf32>, vector<32x12xf32> -> vector<32x36xf32>
    %cst_10 = arith.constant dense<0.000000e+00> : vector<32x72xf32>
    %33 = tpu.matmul %32, %1, %cst_10 {dimension_numbers = #tpu.dot_dimension_numbers<[1], [0], [0], [1], [0, 0, 1, 1], [], []>} : vector<32x36xf32>, vector<36x72xf32>, vector<32x72xf32> -> vector<32x72xf32>
    %34 = vector.broadcast %7 : vector<1x72xf32> to vector<32x72xf32>
    %35 = arith.addf %33, %34 : vector<32x72xf32>
    %36 = vector.extract_strided_slice %35 {offsets = [0, 0], sizes = [32, 36], strides = [1, 1]} : vector<32x72xf32> to vector<32x36xf32>
    %37 = vector.extract_strided_slice %35 {offsets = [0, 36], sizes = [32, 36], strides = [1, 1]} : vector<32x72xf32> to vector<32x36xf32>
    %38 = arith.negf %37 : vector<32x36xf32>
    %39 = math.exp %38 : vector<32x36xf32>
    %cst_11 = arith.constant 1.000000e+00 : f32
    %40 = vector.broadcast %cst_11 : f32 to vector<32x36xf32>
    %41 = arith.addf %40, %39 : vector<32x36xf32>
    %42 = arith.divf %40, %41 : vector<32x36xf32>
    %43 = arith.mulf %36, %42 : vector<32x36xf32>
    %cst_12 = arith.constant dense<0.000000e+00> : vector<32x96xf32>
    %44 = tpu.matmul %43, %2, %cst_12 {dimension_numbers = #tpu.dot_dimension_numbers<[1], [0], [0], [1], [0, 0, 1, 1], [], []>} : vector<32x36xf32>, vector<36x96xf32>, vector<32x96xf32> -> vector<32x96xf32>
    %45 = vector.broadcast %8 : vector<1x96xf32> to vector<32x96xf32>
    %46 = arith.addf %44, %45 : vector<32x96xf32>
    %cst_13 = arith.constant 0.000000e+00 : f32
    %47 = vector.broadcast %cst_13 : f32 to vector<2x32xf32>
    %48 = vector.extract_strided_slice %46 {offsets = [0, 0], sizes = [2, 96], strides = [1, 1]} : vector<32x96xf32> to vector<2x96xf32>
    %cst_14 = arith.constant dense<0.000000e+00> : vector<2x96xf32>
    %49 = tpu.matmul %47, %3, %cst_14 {dimension_numbers = #tpu.dot_dimension_numbers<[1], [0], [0], [1], [0, 0, 1, 1], [], []>} : vector<2x32xf32>, vector<32x96xf32>, vector<2x96xf32> -> vector<2x96xf32>
    %50 = vector.extract_strided_slice %48 {offsets = [0, 0], sizes = [2, 64], strides = [1, 1]} : vector<2x96xf32> to vector<2x64xf32>
    %51 = vector.extract_strided_slice %49 {offsets = [0, 0], sizes = [2, 64], strides = [1, 1]} : vector<2x96xf32> to vector<2x64xf32>
    %52 = arith.addf %50, %51 : vector<2x64xf32>
    %53 = arith.negf %52 : vector<2x64xf32>
    %54 = math.exp %53 : vector<2x64xf32>
    %cst_15 = arith.constant 1.000000e+00 : f32
    %55 = vector.broadcast %cst_15 : f32 to vector<2x64xf32>
    %56 = arith.addf %55, %54 : vector<2x64xf32>
    %57 = arith.divf %55, %56 : vector<2x64xf32>
    %58 = vector.extract_strided_slice %57 {offsets = [0, 0], sizes = [2, 32], strides = [1, 1]} : vector<2x64xf32> to vector<2x32xf32>
    %59 = vector.extract_strided_slice %57 {offsets = [0, 32], sizes = [2, 32], strides = [1, 1]} : vector<2x64xf32> to vector<2x32xf32>
    %60 = vector.extract_strided_slice %48 {offsets = [0, 64], sizes = [2, 32], strides = [1, 1]} : vector<2x96xf32> to vector<2x32xf32>
    %61 = vector.extract_strided_slice %49 {offsets = [0, 64], sizes = [2, 32], strides = [1, 1]} : vector<2x96xf32> to vector<2x32xf32>
    %62 = vector.broadcast %9 : vector<1x32xf32> to vector<2x32xf32>
    %63 = arith.addf %61, %62 : vector<2x32xf32>
    %64 = arith.mulf %58, %63 : vector<2x32xf32>
    %65 = arith.addf %60, %64 : vector<2x32xf32>
    %66 = math.tanh %65 : vector<2x32xf32>
    %cst_16 = arith.constant 1.000000e+00 : f32
    %67 = vector.broadcast %cst_16 : f32 to vector<2x32xf32>
    %68 = arith.subf %67, %59 : vector<2x32xf32>
    %69 = arith.mulf %68, %66 : vector<2x32xf32>
    %70 = arith.mulf %59, %47 : vector<2x32xf32>
    %71 = arith.addf %69, %70 : vector<2x32xf32>
    %72 = vector.extract_strided_slice %46 {offsets = [2, 0], sizes = [2, 96], strides = [1, 1]} : vector<32x96xf32> to vector<2x96xf32>
    %cst_17 = arith.constant dense<0.000000e+00> : vector<2x96xf32>
    %73 = tpu.matmul %71, %3, %cst_17 {dimension_numbers = #tpu.dot_dimension_numbers<[1], [0], [0], [1], [0, 0, 1, 1], [], []>} : vector<2x32xf32>, vector<32x96xf32>, vector<2x96xf32> -> vector<2x96xf32>
    %74 = vector.extract_strided_slice %72 {offsets = [0, 0], sizes = [2, 64], strides = [1, 1]} : vector<2x96xf32> to vector<2x64xf32>
    %75 = vector.extract_strided_slice %73 {offsets = [0, 0], sizes = [2, 64], strides = [1, 1]} : vector<2x96xf32> to vector<2x64xf32>
    %76 = arith.addf %74, %75 : vector<2x64xf32>
    %77 = arith.negf %76 : vector<2x64xf32>
    %78 = math.exp %77 : vector<2x64xf32>
    %cst_18 = arith.constant 1.000000e+00 : f32
    %79 = vector.broadcast %cst_18 : f32 to vector<2x64xf32>
    %80 = arith.addf %79, %78 : vector<2x64xf32>
    %81 = arith.divf %79, %80 : vector<2x64xf32>
    %82 = vector.extract_strided_slice %81 {offsets = [0, 0], sizes = [2, 32], strides = [1, 1]} : vector<2x64xf32> to vector<2x32xf32>
    %83 = vector.extract_strided_slice %81 {offsets = [0, 32], sizes = [2, 32], strides = [1, 1]} : vector<2x64xf32> to vector<2x32xf32>
    %84 = vector.extract_strided_slice %72 {offsets = [0, 64], sizes = [2, 32], strides = [1, 1]} : vector<2x96xf32> to vector<2x32xf32>
    %85 = vector.extract_strided_slice %73 {offsets = [0, 64], sizes = [2, 32], strides = [1, 1]} : vector<2x96xf32> to vector<2x32xf32>
    %86 = vector.broadcast %9 : vector<1x32xf32> to vector<2x32xf32>
    %87 = arith.addf %85, %86 : vector<2x32xf32>
    %88 = arith.mulf %82, %87 : vector<2x32xf32>
    %89 = arith.addf %84, %88 : vector<2x32xf32>
    %90 = math.tanh %89 : vector<2x32xf32>
    %cst_19 = arith.constant 1.000000e+00 : f32
    %91 = vector.broadcast %cst_19 : f32 to vector<2x32xf32>
    %92 = arith.subf %91, %83 : vector<2x32xf32>
    %93 = arith.mulf %92, %90 : vector<2x32xf32>
    %94 = arith.mulf %83, %71 : vector<2x32xf32>
    %95 = arith.addf %93, %94 : vector<2x32xf32>
    %96 = vector.extract_strided_slice %46 {offsets = [4, 0], sizes = [2, 96], strides = [1, 1]} : vector<32x96xf32> to vector<2x96xf32>
    %cst_20 = arith.constant dense<0.000000e+00> : vector<2x96xf32>
    %97 = tpu.matmul %95, %3, %cst_20 {dimension_numbers = #tpu.dot_dimension_numbers<[1], [0], [0], [1], [0, 0, 1, 1], [], []>} : vector<2x32xf32>, vector<32x96xf32>, vector<2x96xf32> -> vector<2x96xf32>
    %98 = vector.extract_strided_slice %96 {offsets = [0, 0], sizes = [2, 64], strides = [1, 1]} : vector<2x96xf32> to vector<2x64xf32>
    %99 = vector.extract_strided_slice %97 {offsets = [0, 0], sizes = [2, 64], strides = [1, 1]} : vector<2x96xf32> to vector<2x64xf32>
    %100 = arith.addf %98, %99 : vector<2x64xf32>
    %101 = arith.negf %100 : vector<2x64xf32>
    %102 = math.exp %101 : vector<2x64xf32>
    %cst_21 = arith.constant 1.000000e+00 : f32
    %103 = vector.broadcast %cst_21 : f32 to vector<2x64xf32>
    %104 = arith.addf %103, %102 : vector<2x64xf32>
    %105 = arith.divf %103, %104 : vector<2x64xf32>
    %106 = vector.extract_strided_slice %105 {offsets = [0, 0], sizes = [2, 32], strides = [1, 1]} : vector<2x64xf32> to vector<2x32xf32>
    %107 = vector.extract_strided_slice %105 {offsets = [0, 32], sizes = [2, 32], strides = [1, 1]} : vector<2x64xf32> to vector<2x32xf32>
    %108 = vector.extract_strided_slice %96 {offsets = [0, 64], sizes = [2, 32], strides = [1, 1]} : vector<2x96xf32> to vector<2x32xf32>
    %109 = vector.extract_strided_slice %97 {offsets = [0, 64], sizes = [2, 32], strides = [1, 1]} : vector<2x96xf32> to vector<2x32xf32>
    %110 = vector.broadcast %9 : vector<1x32xf32> to vector<2x32xf32>
    %111 = arith.addf %109, %110 : vector<2x32xf32>
    %112 = arith.mulf %106, %111 : vector<2x32xf32>
    %113 = arith.addf %108, %112 : vector<2x32xf32>
    %114 = math.tanh %113 : vector<2x32xf32>
    %cst_22 = arith.constant 1.000000e+00 : f32
    %115 = vector.broadcast %cst_22 : f32 to vector<2x32xf32>
    %116 = arith.subf %115, %107 : vector<2x32xf32>
    %117 = arith.mulf %116, %114 : vector<2x32xf32>
    %118 = arith.mulf %107, %95 : vector<2x32xf32>
    %119 = arith.addf %117, %118 : vector<2x32xf32>
    %120 = vector.extract_strided_slice %46 {offsets = [6, 0], sizes = [2, 96], strides = [1, 1]} : vector<32x96xf32> to vector<2x96xf32>
    %cst_23 = arith.constant dense<0.000000e+00> : vector<2x96xf32>
    %121 = tpu.matmul %119, %3, %cst_23 {dimension_numbers = #tpu.dot_dimension_numbers<[1], [0], [0], [1], [0, 0, 1, 1], [], []>} : vector<2x32xf32>, vector<32x96xf32>, vector<2x96xf32> -> vector<2x96xf32>
    %122 = vector.extract_strided_slice %120 {offsets = [0, 0], sizes = [2, 64], strides = [1, 1]} : vector<2x96xf32> to vector<2x64xf32>
    %123 = vector.extract_strided_slice %121 {offsets = [0, 0], sizes = [2, 64], strides = [1, 1]} : vector<2x96xf32> to vector<2x64xf32>
    %124 = arith.addf %122, %123 : vector<2x64xf32>
    %125 = arith.negf %124 : vector<2x64xf32>
    %126 = math.exp %125 : vector<2x64xf32>
    %cst_24 = arith.constant 1.000000e+00 : f32
    %127 = vector.broadcast %cst_24 : f32 to vector<2x64xf32>
    %128 = arith.addf %127, %126 : vector<2x64xf32>
    %129 = arith.divf %127, %128 : vector<2x64xf32>
    %130 = vector.extract_strided_slice %129 {offsets = [0, 0], sizes = [2, 32], strides = [1, 1]} : vector<2x64xf32> to vector<2x32xf32>
    %131 = vector.extract_strided_slice %129 {offsets = [0, 32], sizes = [2, 32], strides = [1, 1]} : vector<2x64xf32> to vector<2x32xf32>
    %132 = vector.extract_strided_slice %120 {offsets = [0, 64], sizes = [2, 32], strides = [1, 1]} : vector<2x96xf32> to vector<2x32xf32>
    %133 = vector.extract_strided_slice %121 {offsets = [0, 64], sizes = [2, 32], strides = [1, 1]} : vector<2x96xf32> to vector<2x32xf32>
    %134 = vector.broadcast %9 : vector<1x32xf32> to vector<2x32xf32>
    %135 = arith.addf %133, %134 : vector<2x32xf32>
    %136 = arith.mulf %130, %135 : vector<2x32xf32>
    %137 = arith.addf %132, %136 : vector<2x32xf32>
    %138 = math.tanh %137 : vector<2x32xf32>
    %cst_25 = arith.constant 1.000000e+00 : f32
    %139 = vector.broadcast %cst_25 : f32 to vector<2x32xf32>
    %140 = arith.subf %139, %131 : vector<2x32xf32>
    %141 = arith.mulf %140, %138 : vector<2x32xf32>
    %142 = arith.mulf %131, %119 : vector<2x32xf32>
    %143 = arith.addf %141, %142 : vector<2x32xf32>
    %144 = vector.extract_strided_slice %46 {offsets = [8, 0], sizes = [2, 96], strides = [1, 1]} : vector<32x96xf32> to vector<2x96xf32>
    %cst_26 = arith.constant dense<0.000000e+00> : vector<2x96xf32>
    %145 = tpu.matmul %143, %3, %cst_26 {dimension_numbers = #tpu.dot_dimension_numbers<[1], [0], [0], [1], [0, 0, 1, 1], [], []>} : vector<2x32xf32>, vector<32x96xf32>, vector<2x96xf32> -> vector<2x96xf32>
    %146 = vector.extract_strided_slice %144 {offsets = [0, 0], sizes = [2, 64], strides = [1, 1]} : vector<2x96xf32> to vector<2x64xf32>
    %147 = vector.extract_strided_slice %145 {offsets = [0, 0], sizes = [2, 64], strides = [1, 1]} : vector<2x96xf32> to vector<2x64xf32>
    %148 = arith.addf %146, %147 : vector<2x64xf32>
    %149 = arith.negf %148 : vector<2x64xf32>
    %150 = math.exp %149 : vector<2x64xf32>
    %cst_27 = arith.constant 1.000000e+00 : f32
    %151 = vector.broadcast %cst_27 : f32 to vector<2x64xf32>
    %152 = arith.addf %151, %150 : vector<2x64xf32>
    %153 = arith.divf %151, %152 : vector<2x64xf32>
    %154 = vector.extract_strided_slice %153 {offsets = [0, 0], sizes = [2, 32], strides = [1, 1]} : vector<2x64xf32> to vector<2x32xf32>
    %155 = vector.extract_strided_slice %153 {offsets = [0, 32], sizes = [2, 32], strides = [1, 1]} : vector<2x64xf32> to vector<2x32xf32>
    %156 = vector.extract_strided_slice %144 {offsets = [0, 64], sizes = [2, 32], strides = [1, 1]} : vector<2x96xf32> to vector<2x32xf32>
    %157 = vector.extract_strided_slice %145 {offsets = [0, 64], sizes = [2, 32], strides = [1, 1]} : vector<2x96xf32> to vector<2x32xf32>
    %158 = vector.broadcast %9 : vector<1x32xf32> to vector<2x32xf32>
    %159 = arith.addf %157, %158 : vector<2x32xf32>
    %160 = arith.mulf %154, %159 : vector<2x32xf32>
    %161 = arith.addf %156, %160 : vector<2x32xf32>
    %162 = math.tanh %161 : vector<2x32xf32>
    %cst_28 = arith.constant 1.000000e+00 : f32
    %163 = vector.broadcast %cst_28 : f32 to vector<2x32xf32>
    %164 = arith.subf %163, %155 : vector<2x32xf32>
    %165 = arith.mulf %164, %162 : vector<2x32xf32>
    %166 = arith.mulf %155, %143 : vector<2x32xf32>
    %167 = arith.addf %165, %166 : vector<2x32xf32>
    %168 = vector.extract_strided_slice %46 {offsets = [10, 0], sizes = [2, 96], strides = [1, 1]} : vector<32x96xf32> to vector<2x96xf32>
    %cst_29 = arith.constant dense<0.000000e+00> : vector<2x96xf32>
    %169 = tpu.matmul %167, %3, %cst_29 {dimension_numbers = #tpu.dot_dimension_numbers<[1], [0], [0], [1], [0, 0, 1, 1], [], []>} : vector<2x32xf32>, vector<32x96xf32>, vector<2x96xf32> -> vector<2x96xf32>
    %170 = vector.extract_strided_slice %168 {offsets = [0, 0], sizes = [2, 64], strides = [1, 1]} : vector<2x96xf32> to vector<2x64xf32>
    %171 = vector.extract_strided_slice %169 {offsets = [0, 0], sizes = [2, 64], strides = [1, 1]} : vector<2x96xf32> to vector<2x64xf32>
    %172 = arith.addf %170, %171 : vector<2x64xf32>
    %173 = arith.negf %172 : vector<2x64xf32>
    %174 = math.exp %173 : vector<2x64xf32>
    %cst_30 = arith.constant 1.000000e+00 : f32
    %175 = vector.broadcast %cst_30 : f32 to vector<2x64xf32>
    %176 = arith.addf %175, %174 : vector<2x64xf32>
    %177 = arith.divf %175, %176 : vector<2x64xf32>
    %178 = vector.extract_strided_slice %177 {offsets = [0, 0], sizes = [2, 32], strides = [1, 1]} : vector<2x64xf32> to vector<2x32xf32>
    %179 = vector.extract_strided_slice %177 {offsets = [0, 32], sizes = [2, 32], strides = [1, 1]} : vector<2x64xf32> to vector<2x32xf32>
    %180 = vector.extract_strided_slice %168 {offsets = [0, 64], sizes = [2, 32], strides = [1, 1]} : vector<2x96xf32> to vector<2x32xf32>
    %181 = vector.extract_strided_slice %169 {offsets = [0, 64], sizes = [2, 32], strides = [1, 1]} : vector<2x96xf32> to vector<2x32xf32>
    %182 = vector.broadcast %9 : vector<1x32xf32> to vector<2x32xf32>
    %183 = arith.addf %181, %182 : vector<2x32xf32>
    %184 = arith.mulf %178, %183 : vector<2x32xf32>
    %185 = arith.addf %180, %184 : vector<2x32xf32>
    %186 = math.tanh %185 : vector<2x32xf32>
    %cst_31 = arith.constant 1.000000e+00 : f32
    %187 = vector.broadcast %cst_31 : f32 to vector<2x32xf32>
    %188 = arith.subf %187, %179 : vector<2x32xf32>
    %189 = arith.mulf %188, %186 : vector<2x32xf32>
    %190 = arith.mulf %179, %167 : vector<2x32xf32>
    %191 = arith.addf %189, %190 : vector<2x32xf32>
    %192 = vector.extract_strided_slice %46 {offsets = [12, 0], sizes = [2, 96], strides = [1, 1]} : vector<32x96xf32> to vector<2x96xf32>
    %cst_32 = arith.constant dense<0.000000e+00> : vector<2x96xf32>
    %193 = tpu.matmul %191, %3, %cst_32 {dimension_numbers = #tpu.dot_dimension_numbers<[1], [0], [0], [1], [0, 0, 1, 1], [], []>} : vector<2x32xf32>, vector<32x96xf32>, vector<2x96xf32> -> vector<2x96xf32>
    %194 = vector.extract_strided_slice %192 {offsets = [0, 0], sizes = [2, 64], strides = [1, 1]} : vector<2x96xf32> to vector<2x64xf32>
    %195 = vector.extract_strided_slice %193 {offsets = [0, 0], sizes = [2, 64], strides = [1, 1]} : vector<2x96xf32> to vector<2x64xf32>
    %196 = arith.addf %194, %195 : vector<2x64xf32>
    %197 = arith.negf %196 : vector<2x64xf32>
    %198 = math.exp %197 : vector<2x64xf32>
    %cst_33 = arith.constant 1.000000e+00 : f32
    %199 = vector.broadcast %cst_33 : f32 to vector<2x64xf32>
    %200 = arith.addf %199, %198 : vector<2x64xf32>
    %201 = arith.divf %199, %200 : vector<2x64xf32>
    %202 = vector.extract_strided_slice %201 {offsets = [0, 0], sizes = [2, 32], strides = [1, 1]} : vector<2x64xf32> to vector<2x32xf32>
    %203 = vector.extract_strided_slice %201 {offsets = [0, 32], sizes = [2, 32], strides = [1, 1]} : vector<2x64xf32> to vector<2x32xf32>
    %204 = vector.extract_strided_slice %192 {offsets = [0, 64], sizes = [2, 32], strides = [1, 1]} : vector<2x96xf32> to vector<2x32xf32>
    %205 = vector.extract_strided_slice %193 {offsets = [0, 64], sizes = [2, 32], strides = [1, 1]} : vector<2x96xf32> to vector<2x32xf32>
    %206 = vector.broadcast %9 : vector<1x32xf32> to vector<2x32xf32>
    %207 = arith.addf %205, %206 : vector<2x32xf32>
    %208 = arith.mulf %202, %207 : vector<2x32xf32>
    %209 = arith.addf %204, %208 : vector<2x32xf32>
    %210 = math.tanh %209 : vector<2x32xf32>
    %cst_34 = arith.constant 1.000000e+00 : f32
    %211 = vector.broadcast %cst_34 : f32 to vector<2x32xf32>
    %212 = arith.subf %211, %203 : vector<2x32xf32>
    %213 = arith.mulf %212, %210 : vector<2x32xf32>
    %214 = arith.mulf %203, %191 : vector<2x32xf32>
    %215 = arith.addf %213, %214 : vector<2x32xf32>
    %216 = vector.extract_strided_slice %46 {offsets = [14, 0], sizes = [2, 96], strides = [1, 1]} : vector<32x96xf32> to vector<2x96xf32>
    %cst_35 = arith.constant dense<0.000000e+00> : vector<2x96xf32>
    %217 = tpu.matmul %215, %3, %cst_35 {dimension_numbers = #tpu.dot_dimension_numbers<[1], [0], [0], [1], [0, 0, 1, 1], [], []>} : vector<2x32xf32>, vector<32x96xf32>, vector<2x96xf32> -> vector<2x96xf32>
    %218 = vector.extract_strided_slice %216 {offsets = [0, 0], sizes = [2, 64], strides = [1, 1]} : vector<2x96xf32> to vector<2x64xf32>
    %219 = vector.extract_strided_slice %217 {offsets = [0, 0], sizes = [2, 64], strides = [1, 1]} : vector<2x96xf32> to vector<2x64xf32>
    %220 = arith.addf %218, %219 : vector<2x64xf32>
    %221 = arith.negf %220 : vector<2x64xf32>
    %222 = math.exp %221 : vector<2x64xf32>
    %cst_36 = arith.constant 1.000000e+00 : f32
    %223 = vector.broadcast %cst_36 : f32 to vector<2x64xf32>
    %224 = arith.addf %223, %222 : vector<2x64xf32>
    %225 = arith.divf %223, %224 : vector<2x64xf32>
    %226 = vector.extract_strided_slice %225 {offsets = [0, 0], sizes = [2, 32], strides = [1, 1]} : vector<2x64xf32> to vector<2x32xf32>
    %227 = vector.extract_strided_slice %225 {offsets = [0, 32], sizes = [2, 32], strides = [1, 1]} : vector<2x64xf32> to vector<2x32xf32>
    %228 = vector.extract_strided_slice %216 {offsets = [0, 64], sizes = [2, 32], strides = [1, 1]} : vector<2x96xf32> to vector<2x32xf32>
    %229 = vector.extract_strided_slice %217 {offsets = [0, 64], sizes = [2, 32], strides = [1, 1]} : vector<2x96xf32> to vector<2x32xf32>
    %230 = vector.broadcast %9 : vector<1x32xf32> to vector<2x32xf32>
    %231 = arith.addf %229, %230 : vector<2x32xf32>
    %232 = arith.mulf %226, %231 : vector<2x32xf32>
    %233 = arith.addf %228, %232 : vector<2x32xf32>
    %234 = math.tanh %233 : vector<2x32xf32>
    %cst_37 = arith.constant 1.000000e+00 : f32
    %235 = vector.broadcast %cst_37 : f32 to vector<2x32xf32>
    %236 = arith.subf %235, %227 : vector<2x32xf32>
    %237 = arith.mulf %236, %234 : vector<2x32xf32>
    %238 = arith.mulf %227, %215 : vector<2x32xf32>
    %239 = arith.addf %237, %238 : vector<2x32xf32>
    %240 = vector.extract_strided_slice %46 {offsets = [16, 0], sizes = [2, 96], strides = [1, 1]} : vector<32x96xf32> to vector<2x96xf32>
    %cst_38 = arith.constant dense<0.000000e+00> : vector<2x96xf32>
    %241 = tpu.matmul %239, %3, %cst_38 {dimension_numbers = #tpu.dot_dimension_numbers<[1], [0], [0], [1], [0, 0, 1, 1], [], []>} : vector<2x32xf32>, vector<32x96xf32>, vector<2x96xf32> -> vector<2x96xf32>
    %242 = vector.extract_strided_slice %240 {offsets = [0, 0], sizes = [2, 64], strides = [1, 1]} : vector<2x96xf32> to vector<2x64xf32>
    %243 = vector.extract_strided_slice %241 {offsets = [0, 0], sizes = [2, 64], strides = [1, 1]} : vector<2x96xf32> to vector<2x64xf32>
    %244 = arith.addf %242, %243 : vector<2x64xf32>
    %245 = arith.negf %244 : vector<2x64xf32>
    %246 = math.exp %245 : vector<2x64xf32>
    %cst_39 = arith.constant 1.000000e+00 : f32
    %247 = vector.broadcast %cst_39 : f32 to vector<2x64xf32>
    %248 = arith.addf %247, %246 : vector<2x64xf32>
    %249 = arith.divf %247, %248 : vector<2x64xf32>
    %250 = vector.extract_strided_slice %249 {offsets = [0, 0], sizes = [2, 32], strides = [1, 1]} : vector<2x64xf32> to vector<2x32xf32>
    %251 = vector.extract_strided_slice %249 {offsets = [0, 32], sizes = [2, 32], strides = [1, 1]} : vector<2x64xf32> to vector<2x32xf32>
    %252 = vector.extract_strided_slice %240 {offsets = [0, 64], sizes = [2, 32], strides = [1, 1]} : vector<2x96xf32> to vector<2x32xf32>
    %253 = vector.extract_strided_slice %241 {offsets = [0, 64], sizes = [2, 32], strides = [1, 1]} : vector<2x96xf32> to vector<2x32xf32>
    %254 = vector.broadcast %9 : vector<1x32xf32> to vector<2x32xf32>
    %255 = arith.addf %253, %254 : vector<2x32xf32>
    %256 = arith.mulf %250, %255 : vector<2x32xf32>
    %257 = arith.addf %252, %256 : vector<2x32xf32>
    %258 = math.tanh %257 : vector<2x32xf32>
    %cst_40 = arith.constant 1.000000e+00 : f32
    %259 = vector.broadcast %cst_40 : f32 to vector<2x32xf32>
    %260 = arith.subf %259, %251 : vector<2x32xf32>
    %261 = arith.mulf %260, %258 : vector<2x32xf32>
    %262 = arith.mulf %251, %239 : vector<2x32xf32>
    %263 = arith.addf %261, %262 : vector<2x32xf32>
    %264 = vector.extract_strided_slice %46 {offsets = [18, 0], sizes = [2, 96], strides = [1, 1]} : vector<32x96xf32> to vector<2x96xf32>
    %cst_41 = arith.constant dense<0.000000e+00> : vector<2x96xf32>
    %265 = tpu.matmul %263, %3, %cst_41 {dimension_numbers = #tpu.dot_dimension_numbers<[1], [0], [0], [1], [0, 0, 1, 1], [], []>} : vector<2x32xf32>, vector<32x96xf32>, vector<2x96xf32> -> vector<2x96xf32>
    %266 = vector.extract_strided_slice %264 {offsets = [0, 0], sizes = [2, 64], strides = [1, 1]} : vector<2x96xf32> to vector<2x64xf32>
    %267 = vector.extract_strided_slice %265 {offsets = [0, 0], sizes = [2, 64], strides = [1, 1]} : vector<2x96xf32> to vector<2x64xf32>
    %268 = arith.addf %266, %267 : vector<2x64xf32>
    %269 = arith.negf %268 : vector<2x64xf32>
    %270 = math.exp %269 : vector<2x64xf32>
    %cst_42 = arith.constant 1.000000e+00 : f32
    %271 = vector.broadcast %cst_42 : f32 to vector<2x64xf32>
    %272 = arith.addf %271, %270 : vector<2x64xf32>
    %273 = arith.divf %271, %272 : vector<2x64xf32>
    %274 = vector.extract_strided_slice %273 {offsets = [0, 0], sizes = [2, 32], strides = [1, 1]} : vector<2x64xf32> to vector<2x32xf32>
    %275 = vector.extract_strided_slice %273 {offsets = [0, 32], sizes = [2, 32], strides = [1, 1]} : vector<2x64xf32> to vector<2x32xf32>
    %276 = vector.extract_strided_slice %264 {offsets = [0, 64], sizes = [2, 32], strides = [1, 1]} : vector<2x96xf32> to vector<2x32xf32>
    %277 = vector.extract_strided_slice %265 {offsets = [0, 64], sizes = [2, 32], strides = [1, 1]} : vector<2x96xf32> to vector<2x32xf32>
    %278 = vector.broadcast %9 : vector<1x32xf32> to vector<2x32xf32>
    %279 = arith.addf %277, %278 : vector<2x32xf32>
    %280 = arith.mulf %274, %279 : vector<2x32xf32>
    %281 = arith.addf %276, %280 : vector<2x32xf32>
    %282 = math.tanh %281 : vector<2x32xf32>
    %cst_43 = arith.constant 1.000000e+00 : f32
    %283 = vector.broadcast %cst_43 : f32 to vector<2x32xf32>
    %284 = arith.subf %283, %275 : vector<2x32xf32>
    %285 = arith.mulf %284, %282 : vector<2x32xf32>
    %286 = arith.mulf %275, %263 : vector<2x32xf32>
    %287 = arith.addf %285, %286 : vector<2x32xf32>
    %288 = vector.extract_strided_slice %46 {offsets = [20, 0], sizes = [2, 96], strides = [1, 1]} : vector<32x96xf32> to vector<2x96xf32>
    %cst_44 = arith.constant dense<0.000000e+00> : vector<2x96xf32>
    %289 = tpu.matmul %287, %3, %cst_44 {dimension_numbers = #tpu.dot_dimension_numbers<[1], [0], [0], [1], [0, 0, 1, 1], [], []>} : vector<2x32xf32>, vector<32x96xf32>, vector<2x96xf32> -> vector<2x96xf32>
    %290 = vector.extract_strided_slice %288 {offsets = [0, 0], sizes = [2, 64], strides = [1, 1]} : vector<2x96xf32> to vector<2x64xf32>
    %291 = vector.extract_strided_slice %289 {offsets = [0, 0], sizes = [2, 64], strides = [1, 1]} : vector<2x96xf32> to vector<2x64xf32>
    %292 = arith.addf %290, %291 : vector<2x64xf32>
    %293 = arith.negf %292 : vector<2x64xf32>
    %294 = math.exp %293 : vector<2x64xf32>
    %cst_45 = arith.constant 1.000000e+00 : f32
    %295 = vector.broadcast %cst_45 : f32 to vector<2x64xf32>
    %296 = arith.addf %295, %294 : vector<2x64xf32>
    %297 = arith.divf %295, %296 : vector<2x64xf32>
    %298 = vector.extract_strided_slice %297 {offsets = [0, 0], sizes = [2, 32], strides = [1, 1]} : vector<2x64xf32> to vector<2x32xf32>
    %299 = vector.extract_strided_slice %297 {offsets = [0, 32], sizes = [2, 32], strides = [1, 1]} : vector<2x64xf32> to vector<2x32xf32>
    %300 = vector.extract_strided_slice %288 {offsets = [0, 64], sizes = [2, 32], strides = [1, 1]} : vector<2x96xf32> to vector<2x32xf32>
    %301 = vector.extract_strided_slice %289 {offsets = [0, 64], sizes = [2, 32], strides = [1, 1]} : vector<2x96xf32> to vector<2x32xf32>
    %302 = vector.broadcast %9 : vector<1x32xf32> to vector<2x32xf32>
    %303 = arith.addf %301, %302 : vector<2x32xf32>
    %304 = arith.mulf %298, %303 : vector<2x32xf32>
    %305 = arith.addf %300, %304 : vector<2x32xf32>
    %306 = math.tanh %305 : vector<2x32xf32>
    %cst_46 = arith.constant 1.000000e+00 : f32
    %307 = vector.broadcast %cst_46 : f32 to vector<2x32xf32>
    %308 = arith.subf %307, %299 : vector<2x32xf32>
    %309 = arith.mulf %308, %306 : vector<2x32xf32>
    %310 = arith.mulf %299, %287 : vector<2x32xf32>
    %311 = arith.addf %309, %310 : vector<2x32xf32>
    %312 = vector.extract_strided_slice %46 {offsets = [22, 0], sizes = [2, 96], strides = [1, 1]} : vector<32x96xf32> to vector<2x96xf32>
    %cst_47 = arith.constant dense<0.000000e+00> : vector<2x96xf32>
    %313 = tpu.matmul %311, %3, %cst_47 {dimension_numbers = #tpu.dot_dimension_numbers<[1], [0], [0], [1], [0, 0, 1, 1], [], []>} : vector<2x32xf32>, vector<32x96xf32>, vector<2x96xf32> -> vector<2x96xf32>
    %314 = vector.extract_strided_slice %312 {offsets = [0, 0], sizes = [2, 64], strides = [1, 1]} : vector<2x96xf32> to vector<2x64xf32>
    %315 = vector.extract_strided_slice %313 {offsets = [0, 0], sizes = [2, 64], strides = [1, 1]} : vector<2x96xf32> to vector<2x64xf32>
    %316 = arith.addf %314, %315 : vector<2x64xf32>
    %317 = arith.negf %316 : vector<2x64xf32>
    %318 = math.exp %317 : vector<2x64xf32>
    %cst_48 = arith.constant 1.000000e+00 : f32
    %319 = vector.broadcast %cst_48 : f32 to vector<2x64xf32>
    %320 = arith.addf %319, %318 : vector<2x64xf32>
    %321 = arith.divf %319, %320 : vector<2x64xf32>
    %322 = vector.extract_strided_slice %321 {offsets = [0, 0], sizes = [2, 32], strides = [1, 1]} : vector<2x64xf32> to vector<2x32xf32>
    %323 = vector.extract_strided_slice %321 {offsets = [0, 32], sizes = [2, 32], strides = [1, 1]} : vector<2x64xf32> to vector<2x32xf32>
    %324 = vector.extract_strided_slice %312 {offsets = [0, 64], sizes = [2, 32], strides = [1, 1]} : vector<2x96xf32> to vector<2x32xf32>
    %325 = vector.extract_strided_slice %313 {offsets = [0, 64], sizes = [2, 32], strides = [1, 1]} : vector<2x96xf32> to vector<2x32xf32>
    %326 = vector.broadcast %9 : vector<1x32xf32> to vector<2x32xf32>
    %327 = arith.addf %325, %326 : vector<2x32xf32>
    %328 = arith.mulf %322, %327 : vector<2x32xf32>
    %329 = arith.addf %324, %328 : vector<2x32xf32>
    %330 = math.tanh %329 : vector<2x32xf32>
    %cst_49 = arith.constant 1.000000e+00 : f32
    %331 = vector.broadcast %cst_49 : f32 to vector<2x32xf32>
    %332 = arith.subf %331, %323 : vector<2x32xf32>
    %333 = arith.mulf %332, %330 : vector<2x32xf32>
    %334 = arith.mulf %323, %311 : vector<2x32xf32>
    %335 = arith.addf %333, %334 : vector<2x32xf32>
    %336 = vector.extract_strided_slice %46 {offsets = [24, 0], sizes = [2, 96], strides = [1, 1]} : vector<32x96xf32> to vector<2x96xf32>
    %cst_50 = arith.constant dense<0.000000e+00> : vector<2x96xf32>
    %337 = tpu.matmul %335, %3, %cst_50 {dimension_numbers = #tpu.dot_dimension_numbers<[1], [0], [0], [1], [0, 0, 1, 1], [], []>} : vector<2x32xf32>, vector<32x96xf32>, vector<2x96xf32> -> vector<2x96xf32>
    %338 = vector.extract_strided_slice %336 {offsets = [0, 0], sizes = [2, 64], strides = [1, 1]} : vector<2x96xf32> to vector<2x64xf32>
    %339 = vector.extract_strided_slice %337 {offsets = [0, 0], sizes = [2, 64], strides = [1, 1]} : vector<2x96xf32> to vector<2x64xf32>
    %340 = arith.addf %338, %339 : vector<2x64xf32>
    %341 = arith.negf %340 : vector<2x64xf32>
    %342 = math.exp %341 : vector<2x64xf32>
    %cst_51 = arith.constant 1.000000e+00 : f32
    %343 = vector.broadcast %cst_51 : f32 to vector<2x64xf32>
    %344 = arith.addf %343, %342 : vector<2x64xf32>
    %345 = arith.divf %343, %344 : vector<2x64xf32>
    %346 = vector.extract_strided_slice %345 {offsets = [0, 0], sizes = [2, 32], strides = [1, 1]} : vector<2x64xf32> to vector<2x32xf32>
    %347 = vector.extract_strided_slice %345 {offsets = [0, 32], sizes = [2, 32], strides = [1, 1]} : vector<2x64xf32> to vector<2x32xf32>
    %348 = vector.extract_strided_slice %336 {offsets = [0, 64], sizes = [2, 32], strides = [1, 1]} : vector<2x96xf32> to vector<2x32xf32>
    %349 = vector.extract_strided_slice %337 {offsets = [0, 64], sizes = [2, 32], strides = [1, 1]} : vector<2x96xf32> to vector<2x32xf32>
    %350 = vector.broadcast %9 : vector<1x32xf32> to vector<2x32xf32>
    %351 = arith.addf %349, %350 : vector<2x32xf32>
    %352 = arith.mulf %346, %351 : vector<2x32xf32>
    %353 = arith.addf %348, %352 : vector<2x32xf32>
    %354 = math.tanh %353 : vector<2x32xf32>
    %cst_52 = arith.constant 1.000000e+00 : f32
    %355 = vector.broadcast %cst_52 : f32 to vector<2x32xf32>
    %356 = arith.subf %355, %347 : vector<2x32xf32>
    %357 = arith.mulf %356, %354 : vector<2x32xf32>
    %358 = arith.mulf %347, %335 : vector<2x32xf32>
    %359 = arith.addf %357, %358 : vector<2x32xf32>
    %360 = vector.extract_strided_slice %46 {offsets = [26, 0], sizes = [2, 96], strides = [1, 1]} : vector<32x96xf32> to vector<2x96xf32>
    %cst_53 = arith.constant dense<0.000000e+00> : vector<2x96xf32>
    %361 = tpu.matmul %359, %3, %cst_53 {dimension_numbers = #tpu.dot_dimension_numbers<[1], [0], [0], [1], [0, 0, 1, 1], [], []>} : vector<2x32xf32>, vector<32x96xf32>, vector<2x96xf32> -> vector<2x96xf32>
    %362 = vector.extract_strided_slice %360 {offsets = [0, 0], sizes = [2, 64], strides = [1, 1]} : vector<2x96xf32> to vector<2x64xf32>
    %363 = vector.extract_strided_slice %361 {offsets = [0, 0], sizes = [2, 64], strides = [1, 1]} : vector<2x96xf32> to vector<2x64xf32>
    %364 = arith.addf %362, %363 : vector<2x64xf32>
    %365 = arith.negf %364 : vector<2x64xf32>
    %366 = math.exp %365 : vector<2x64xf32>
    %cst_54 = arith.constant 1.000000e+00 : f32
    %367 = vector.broadcast %cst_54 : f32 to vector<2x64xf32>
    %368 = arith.addf %367, %366 : vector<2x64xf32>
    %369 = arith.divf %367, %368 : vector<2x64xf32>
    %370 = vector.extract_strided_slice %369 {offsets = [0, 0], sizes = [2, 32], strides = [1, 1]} : vector<2x64xf32> to vector<2x32xf32>
    %371 = vector.extract_strided_slice %369 {offsets = [0, 32], sizes = [2, 32], strides = [1, 1]} : vector<2x64xf32> to vector<2x32xf32>
    %372 = vector.extract_strided_slice %360 {offsets = [0, 64], sizes = [2, 32], strides = [1, 1]} : vector<2x96xf32> to vector<2x32xf32>
    %373 = vector.extract_strided_slice %361 {offsets = [0, 64], sizes = [2, 32], strides = [1, 1]} : vector<2x96xf32> to vector<2x32xf32>
    %374 = vector.broadcast %9 : vector<1x32xf32> to vector<2x32xf32>
    %375 = arith.addf %373, %374 : vector<2x32xf32>
    %376 = arith.mulf %370, %375 : vector<2x32xf32>
    %377 = arith.addf %372, %376 : vector<2x32xf32>
    %378 = math.tanh %377 : vector<2x32xf32>
    %cst_55 = arith.constant 1.000000e+00 : f32
    %379 = vector.broadcast %cst_55 : f32 to vector<2x32xf32>
    %380 = arith.subf %379, %371 : vector<2x32xf32>
    %381 = arith.mulf %380, %378 : vector<2x32xf32>
    %382 = arith.mulf %371, %359 : vector<2x32xf32>
    %383 = arith.addf %381, %382 : vector<2x32xf32>
    %384 = vector.extract_strided_slice %46 {offsets = [28, 0], sizes = [2, 96], strides = [1, 1]} : vector<32x96xf32> to vector<2x96xf32>
    %cst_56 = arith.constant dense<0.000000e+00> : vector<2x96xf32>
    %385 = tpu.matmul %383, %3, %cst_56 {dimension_numbers = #tpu.dot_dimension_numbers<[1], [0], [0], [1], [0, 0, 1, 1], [], []>} : vector<2x32xf32>, vector<32x96xf32>, vector<2x96xf32> -> vector<2x96xf32>
    %386 = vector.extract_strided_slice %384 {offsets = [0, 0], sizes = [2, 64], strides = [1, 1]} : vector<2x96xf32> to vector<2x64xf32>
    %387 = vector.extract_strided_slice %385 {offsets = [0, 0], sizes = [2, 64], strides = [1, 1]} : vector<2x96xf32> to vector<2x64xf32>
    %388 = arith.addf %386, %387 : vector<2x64xf32>
    %389 = arith.negf %388 : vector<2x64xf32>
    %390 = math.exp %389 : vector<2x64xf32>
    %cst_57 = arith.constant 1.000000e+00 : f32
    %391 = vector.broadcast %cst_57 : f32 to vector<2x64xf32>
    %392 = arith.addf %391, %390 : vector<2x64xf32>
    %393 = arith.divf %391, %392 : vector<2x64xf32>
    %394 = vector.extract_strided_slice %393 {offsets = [0, 0], sizes = [2, 32], strides = [1, 1]} : vector<2x64xf32> to vector<2x32xf32>
    %395 = vector.extract_strided_slice %393 {offsets = [0, 32], sizes = [2, 32], strides = [1, 1]} : vector<2x64xf32> to vector<2x32xf32>
    %396 = vector.extract_strided_slice %384 {offsets = [0, 64], sizes = [2, 32], strides = [1, 1]} : vector<2x96xf32> to vector<2x32xf32>
    %397 = vector.extract_strided_slice %385 {offsets = [0, 64], sizes = [2, 32], strides = [1, 1]} : vector<2x96xf32> to vector<2x32xf32>
    %398 = vector.broadcast %9 : vector<1x32xf32> to vector<2x32xf32>
    %399 = arith.addf %397, %398 : vector<2x32xf32>
    %400 = arith.mulf %394, %399 : vector<2x32xf32>
    %401 = arith.addf %396, %400 : vector<2x32xf32>
    %402 = math.tanh %401 : vector<2x32xf32>
    %cst_58 = arith.constant 1.000000e+00 : f32
    %403 = vector.broadcast %cst_58 : f32 to vector<2x32xf32>
    %404 = arith.subf %403, %395 : vector<2x32xf32>
    %405 = arith.mulf %404, %402 : vector<2x32xf32>
    %406 = arith.mulf %395, %383 : vector<2x32xf32>
    %407 = arith.addf %405, %406 : vector<2x32xf32>
    %408 = vector.extract_strided_slice %46 {offsets = [30, 0], sizes = [2, 96], strides = [1, 1]} : vector<32x96xf32> to vector<2x96xf32>
    %cst_59 = arith.constant dense<0.000000e+00> : vector<2x96xf32>
    %409 = tpu.matmul %407, %3, %cst_59 {dimension_numbers = #tpu.dot_dimension_numbers<[1], [0], [0], [1], [0, 0, 1, 1], [], []>} : vector<2x32xf32>, vector<32x96xf32>, vector<2x96xf32> -> vector<2x96xf32>
    %410 = vector.extract_strided_slice %408 {offsets = [0, 0], sizes = [2, 64], strides = [1, 1]} : vector<2x96xf32> to vector<2x64xf32>
    %411 = vector.extract_strided_slice %409 {offsets = [0, 0], sizes = [2, 64], strides = [1, 1]} : vector<2x96xf32> to vector<2x64xf32>
    %412 = arith.addf %410, %411 : vector<2x64xf32>
    %413 = arith.negf %412 : vector<2x64xf32>
    %414 = math.exp %413 : vector<2x64xf32>
    %cst_60 = arith.constant 1.000000e+00 : f32
    %415 = vector.broadcast %cst_60 : f32 to vector<2x64xf32>
    %416 = arith.addf %415, %414 : vector<2x64xf32>
    %417 = arith.divf %415, %416 : vector<2x64xf32>
    %418 = vector.extract_strided_slice %417 {offsets = [0, 0], sizes = [2, 32], strides = [1, 1]} : vector<2x64xf32> to vector<2x32xf32>
    %419 = vector.extract_strided_slice %417 {offsets = [0, 32], sizes = [2, 32], strides = [1, 1]} : vector<2x64xf32> to vector<2x32xf32>
    %420 = vector.extract_strided_slice %408 {offsets = [0, 64], sizes = [2, 32], strides = [1, 1]} : vector<2x96xf32> to vector<2x32xf32>
    %421 = vector.extract_strided_slice %409 {offsets = [0, 64], sizes = [2, 32], strides = [1, 1]} : vector<2x96xf32> to vector<2x32xf32>
    %422 = vector.broadcast %9 : vector<1x32xf32> to vector<2x32xf32>
    %423 = arith.addf %421, %422 : vector<2x32xf32>
    %424 = arith.mulf %418, %423 : vector<2x32xf32>
    %425 = arith.addf %420, %424 : vector<2x32xf32>
    %426 = math.tanh %425 : vector<2x32xf32>
    %cst_61 = arith.constant 1.000000e+00 : f32
    %427 = vector.broadcast %cst_61 : f32 to vector<2x32xf32>
    %428 = arith.subf %427, %419 : vector<2x32xf32>
    %429 = arith.mulf %428, %426 : vector<2x32xf32>
    %430 = arith.mulf %419, %407 : vector<2x32xf32>
    %431 = arith.addf %429, %430 : vector<2x32xf32>
    %432 = tpu.concatenate %71, %95, %119, %143, %167, %191, %215, %239, %263, %287, %311, %335, %359, %383, %407, %431 in 0 : vector<2x32xf32>, vector<2x32xf32>, vector<2x32xf32>, vector<2x32xf32>, vector<2x32xf32>, vector<2x32xf32>, vector<2x32xf32>, vector<2x32xf32>, vector<2x32xf32>, vector<2x32xf32>, vector<2x32xf32>, vector<2x32xf32>, vector<2x32xf32>, vector<2x32xf32>, vector<2x32xf32>, vector<2x32xf32> -> vector<32x32xf32>
    %433 = tpu.concatenate %432, %43 in 1 : vector<32x32xf32>, vector<32x36xf32> -> vector<32x68xf32>
    %cst_62 = arith.constant dense<0.000000e+00> : vector<32x8xf32>
    %434 = tpu.matmul %433, %4, %cst_62 {dimension_numbers = #tpu.dot_dimension_numbers<[1], [0], [0], [1], [0, 0, 1, 1], [], []>} : vector<32x68xf32>, vector<68x8xf32>, vector<32x8xf32> -> vector<32x8xf32>
    %435 = vector.broadcast %10 : vector<1x8xf32> to vector<32x8xf32>
    %436 = arith.addf %434, %435 : vector<32x8xf32>
    %c0_63 = arith.constant 0 : index
    %c0_64 = arith.constant 0 : index
    %437 = vector.load %arg3[%c0_63, %c0_64] : memref<32x8xf32, #tpu.memory_space<vmem>>, vector<32x8xf32>
    tpu.vector_store %arg3[%c0_63, %c0_64], %436 {strides = array<i32>} : memref<32x8xf32, #tpu.memory_space<vmem>>, vector<32x8xf32>,
    return
  }
  func.func @transform_0(%arg0: i32) -> (i32, i32) {
    %c0_i32 = arith.constant 0 : i32
    %c0_i32_0 = arith.constant 0 : i32
    %c0_i32_1 = arith.constant 0 : i32
    return %c0_i32, %c0_i32_0 : i32, i32
  }
  func.func @transform_1(%arg0: i32) -> (i32, i32) {
    %c0_i32 = arith.constant 0 : i32
    %c0_i32_0 = arith.constant 0 : i32
    %c0_i32_1 = arith.constant 0 : i32
    return %c0_i32, %c0_i32_0 : i32, i32
  }
  func.func @transform_2(%arg0: i32) -> (i32, i32) {
    %c0_i32 = arith.constant 0 : i32
    %c0_i32_0 = arith.constant 0 : i32
    %c0_i32_1 = arith.constant 0 : i32
    return %c0_i32, %c0_i32_0 : i32, i32
  }
}

</mosaic_0001>

<bundles_post_ra>
// kernel: conv_rnn_forward.1
= control target key start
LH: loop header
LB: loop body
LE: loop exit
PB: predicated region body
PF: predicated region fallthrough
CT: control target
= control target key end

     0   :  { %vm75_vm0 = vcmask 1043456   ;;  %v3208_v1 = vmov 0.0   ;;  %vm46_vm1 = vcmask 1045504   ;;  %s3209_s21 = smov 8   ;;  %s3210_s22 = smov 4   ;;  %vm3211_vm2 = vmmov 1   ;;  %s3767_s0 = inlined_call_operand.vmem [shape: f32[32,4], index: 0, kind: input, shape index: {}]   ;;  %s3768_s1 = inlined_call_operand.vmem [shape: f32[208,96], index: 1, kind: input, shape index: {}]   ;;  %s3769_s2 = inlined_call_operand.vmem [shape: f32[32,8], index: 2, kind: output, shape index: {}]  }
   0x1   :  { %v37_v0 = vld [vmem:[%s3767_s0] sm:$0xff]  ;;  %v76_v2 = vrot.slane %v3208_v1, 4  ;;  %v47_v3 = vrot.slane %v3208_v1, 2  ;;  %v38_v4 = vld [vmem:[%s3767_s0 + $0x8] sm:$0xff]  ;;  %v39_v9 = vld [vmem:[%s3767_s0 + $0x10] sm:$0xff]  ;;  %vm104_vm4 = vcmask 31744   ;;  %v118_v52 = vlaneseq }
   0x2   :  { %v77_v5 = vrot.slane %v37_v0, 4  ;;  %v48_v6 = vrot.slane %v37_v0, 2  ;;  %v79_v7 = vrot.slane %v38_v4, 4  ;;  %v50_v8 = vrot.slane %v38_v4, 2  ;;  %v3250_v10 = vld [vmem:[%s3767_s0 + $0x18] sm:$0xff]  ;;  %v11_v11 = vld [vmem:[%s3768_s1] sm:$0xff]  ;;  %vm2925_vm3 = vmpackc.low %vm75_vm0, %vm3211_vm2 }
   0x3   :  { %v12_v12 = vld [vmem:[%s3768_s1 + $0x8] sm:$0xf]  ;;  %v52_v15 = vrot.slane %v39_v9, 2  ;;  %v54_v18 = vrot.slane %v3250_v10, 2  ;;  %v81_v22 = vrot.slane %v39_v9, 4  ;;  %v83_v23 = vrot.slane %v3250_v10, 4 }
   0x4   :  { %v78_v13 = vsel %vm75_vm0, %v76_v2, %v77_v5  ;;  %v49_v14 = vsel %vm46_vm1, %v47_v3, %v48_v6  ;;  %v80_v16 = vsel %vm75_vm0, %v77_v5, %v79_v7  ;;  %v51_v17 = vsel %vm46_vm1, %v48_v6, %v50_v8  ;;  %v3296_v55 = vld [vmem:[%s3768_s1 + $0xc8] sm:$0xff]  ;;  %s3212_s24 = smov 116   ;;  %s3213_s7 = smov 12  }
   0x5   :  { %86 = vrot.lane.b32.xlu1 %v78_v13, %s3209_s21  ;;  %57 = vrot.lane.b32.xlu0 %v49_v14, %s3210_s22  ;;  %v2924_v19 = vpack.c.bf16 %v12_v12, %v11_v11  ;;  %v55_v20 = vsel %vm46_vm1, %v52_v15, %v54_v18  ;;  %v53_v21 = vsel %vm46_vm1, %v50_v8, %v52_v15  ;;  %vm111_vm5 = vcmask 64512   ;;  %s3214_s8 = smov 24   ;;  %s3216_s26 = smov 92  }
   0x6   :  { %v84_v24 = vsel %vm75_vm0, %v81_v22, %v83_v23  ;;  %v82_v25 = vsel %vm75_vm0, %v79_v7, %v81_v22  ;;  %v56_v26 = vsel %vm46_vm1, %v54_v18, %v47_v3  ;;  %v85_v27 = vsel %vm75_vm0, %v83_v23, %v76_v2  ;;  %s3218_s27 = smov 64   ;;  %s3219_s28 = smov 96  }
   0x7   :  { %2926 = vmatprep.subr.msk.bf16.mxu0 %vm2925_vm3, %v2924_v19  ;;  %vm122_vm6 = vcmask 97280   ;;  %v3290_v53 = vshrl.u32 %v118_v52, 7  ;;  %vm310_vm7 = vcmask 1041408   ;;  %vm358_vm8 = vcmask 195584   ;;  %s3220_s19 = smov 32  }
   0x8   :  { %2929 = vmatpush3.bf16.msk.msra.mxu0 %vm2925_vm3, %v2924_v19  ;;  %vm367_vm9 = vcmask 293888   ;;  %vm3217_vm10 = vmmov 0   ;;  %vm616_vm11 = vcmask 261120   ;;  %vm2388_vm12 = vcmask 556032  }
   0x9   :  { %88 = vrot.lane.b32.xlu1 %v80_v16, %s3209_s21  ;;  %59 = vrot.lane.b32.xlu0 %v51_v17, %s3210_s22  ;;  %v120_v54 = vsub.s32 0, %v3290_v53 }
   0xb   :  { %v121_v56 = vrot.slane %v3296_v55, %v120_v54 }
   0xd   :  { %63 = vrot.lane.b32.xlu1 %v55_v20, %s3210_s22  ;;  %61 = vrot.lane.b32.xlu0 %v53_v21, %s3210_s22 }
  0x11   :  { %92 = vrot.lane.b32.xlu1 %v84_v24, %s3209_s21  ;;  %90 = vrot.lane.b32.xlu0 %v82_v25, %s3209_s21 }
  0x15   :  { %67 = vrot.lane.b32.xlu1 %v47_v3, %s3210_s22  ;;  %65 = vrot.lane.b32.xlu0 %v56_v26, %s3210_s22 }
  0x19   :  { %96 = vrot.lane.b32.xlu1 %v76_v2, %s3209_s21  ;;  %94 = vrot.lane.b32.xlu0 %v85_v27, %s3209_s21 }
  0x77   :  { %v87_v28 = vpop.permute.xlu1 %86  ;;  %v58_v29 = vpop.permute.xlu0 %57 }
  0x78   :  { %v105_v30 = vsel %vm104_vm4, 0.0, %v58_v29 }
  0x79   :  { %v112_v31 = vsel %vm111_vm5, %v105_v30, %v87_v28  ;;  %v13_v30 = vld [vmem:[%s3768_s1 + $0x10] sm:$0xff] }
  0x7a   :  { %2683 = vmatprep.mubr.msk.f32.mxu0 %vm122_vm6, %v112_v31  ;;  %v14_v31 = vld [vmem:[%s3768_s1 + $0x18] sm:$0xff] }
  0x7b   :  { %v89_v32 = vpop.permute.xlu1 %88  ;;  %v60_v33 = vpop.permute.xlu0 %59 }
  0x7c   :  { %v106_v34 = vsel %vm104_vm4, %v37_v0, %v60_v33  ;;  %v2930_v33 = vpack.c.bf16 %v14_v31, %v13_v30 }
  0x7d   :  { %v113_v35 = vsel %vm111_vm5, %v106_v34, %v89_v32  ;;  %v15_v32 = vld [vmem:[%s3768_s1 + $0x20] sm:$0xff]  ;;  %v16_v34 = vld [vmem:[%s3768_s1 + $0x28] sm:$0xff] }
  0x7e   :  { %2684 = vmatmul.mubr.msk.f32.vlgmr.msra.gmra.mrb[0].mxu0 %vm122_vm6, %v113_v35  ;;  %v2934_v35 = vpack.c.bf16 %v16_v34, %v15_v32  ;;  %2931 = vmatprep.subr.bf16.mxu1 %v2930_v33 }
  0x7f   :  { %v64_v36 = vpop.permute.xlu1 %63  ;;  %v62_v37 = vpop.permute.xlu0 %61  ;;  %2933 = vmatpush3.bf16.msra.mxu1 %v2930_v33 }
  0x80   :  { %v108_v38 = vsel %vm104_vm4, %v39_v9, %v64_v36  ;;  %v107_v39 = vsel %vm104_vm4, %v38_v4, %v62_v37  ;;  %2935 = vmatprep.subr.bf16.mxu1 %v2934_v35 }
  0x83   :  { %v93_v40 = vpop.permute.xlu1 %92  ;;  %v91_v41 = vpop.permute.xlu0 %90  ;;  %2937 = vmatpush3.bf16.msra.mxu1 %v2934_v35 }
  0x84   :  { %v115_v42 = vsel %vm111_vm5, %v108_v38, %v93_v40  ;;  %v114_v43 = vsel %vm111_vm5, %v107_v39, %v91_v41  ;;  %v17_v41 = vld [vmem:[%s3768_s1 + $0x30] sm:$0xf] }
  0x85   :  { %2686 = vmatprep.mubr.msk.f32.mxu0 %vm122_vm6, %v114_v43  ;;  %2700 = vmatprep.subr.msk.mxu1 %vm75_vm0, %v17_v41 }
  0x86   :  { %2687 = vmatmul.mubr.msk.f32.gmra.mrb[2].mxu0 %vm122_vm6, %v115_v42 }
  0x87   :  { %v68_v44 = vpop.permute.xlu1 %67  ;;  %v66_v45 = vpop.permute.xlu0 %65  ;;  %2701 = vmatpush3.msk.msra.mxu1 %vm75_vm0, %v17_v41 }
  0x88   :  { %v110_v46 = vsel %vm104_vm4, 0.0, %v68_v44  ;;  %v109_v47 = vsel %vm104_vm4, %v3250_v10, %v66_v45 }
  0x8b   :  { %v97_v48 = vpop.permute.xlu1 %96  ;;  %v95_v49 = vpop.permute.xlu0 %94 }
  0x8c   :  { %v117_v50 = vsel %vm111_vm5, %v110_v46, %v97_v48  ;;  %v116_v51 = vsel %vm111_vm5, %v109_v47, %v95_v49 }
  0x8d   :  { %2689 = vmatprep.mubr.msk.f32.mxu0 %vm122_vm6, %v116_v51 }
  0x8e   :  { %2690 = vmatmul.mubr.msk.f32.gmra.mrb[4].mxu0 %vm122_vm6, %v117_v50 }
 0x151   :  { %v2685_v57 = vpop.f32.mrb[0].mxu0 }
 0x152   :  { %v3299_v58 = vadd.f32 %v2685_v57, %v121_v56  ;;  %v210_v59 = vpop.f32.mrb[1].mxu0 }
 0x153   :  { %v3301_v60 = vadd.f32 %v210_v59, %v121_v56 }
 0x154   :  { %v2505_v61 = vmul.f32 -1.442695, %v3299_v58 }
 0x155   :  { %v2504_v62 = vmul.f32 -1.442695, %v3301_v60 }
 0x156   :  { %3071 = vpow2.f32 %v2505_v61 }
 0x157   :  { %3073 = vpow2.f32 %v2504_v62 }
 0x159   :  { %v2688_v63 = vpop.f32.mrb[2].mxu0 }
 0x15a   :  { %v3305_v0 = vadd.f32 %v2688_v63, %v121_v56  ;;  %v220_v2 = vpop.f32.mrb[3].mxu0 }
 0x15b   :  { %v3307_v3 = vadd.f32 %v220_v2, %v121_v56 }
 0x15c   :  { %v2507_v4 = vmul.f32 -1.442695, %v3305_v0 }
 0x15d   :  { %v2506_v5 = vmul.f32 -1.442695, %v3307_v3 }
 0x15e   :  { %3075 = vpow2.f32 %v2507_v4 }
 0x15f   :  { %3077 = vpow2.f32 %v2506_v5 }
 0x160   :  { %v3072_v6 = vpop.eup %3071 }
 0x161   :  { %v3074_v7 = vpop.eup %3073  ;;  %v258_v8 = vadd.f32 1.0, %v3072_v6  ;;  %v2691_v9 = vpop.f32.mrb[4].mxu0 }
 0x162   :  { %v257_v10 = vadd.f32 1.0, %v3074_v7  ;;  %v3311_v11 = vadd.f32 %v2691_v9, %v121_v56  ;;  %v230_v12 = vpop.f32.mrb[5].mxu0 }
 0x163   :  { %3079 = vrcp.f32 %v258_v8  ;;  %v3313_v13 = vadd.f32 %v230_v12, %v121_v56 }
 0x164   :  { %3081 = vrcp.f32 %v257_v10  ;;  %v2509_v14 = vmul.f32 -1.442695, %v3311_v11 }
 0x165   :  { %v2508_v15 = vmul.f32 -1.442695, %v3313_v13 }
 0x166   :  { %3083 = vpow2.f32 %v2509_v14 }
 0x167   :  { %3085 = vpow2.f32 %v2508_v15 }
 0x168   :  { %v3076_v16 = vpop.eup %3075 }
 0x169   :  { %v3078_v17 = vpop.eup %3077  ;;  %v260_v18 = vadd.f32 1.0, %v3076_v16 }
 0x16a   :  { %v259_v19 = vadd.f32 1.0, %v3078_v17 }
 0x16b   :  { %3087 = vrcp.f32 %v260_v18 }
 0x16c   :  { %3089 = vrcp.f32 %v259_v19 }
 0x16d   :  { %v3080_v20 = vpop.eup %3079 }
 0x16e   :  { %v3082_v21 = vpop.eup %3081  ;;  %283 = vrot.lane.b32.xlu1 %v3080_v20, %s3212_s24 }
 0x16f   :  { %281 = vrot.lane.b32.xlu0 %v3082_v21, %s3212_s24 }
 0x170   :  { %v3084_v22 = vpop.eup %3083 }
 0x171   :  { %v3086_v23 = vpop.eup %3085  ;;  %v262_v24 = vadd.f32 1.0, %v3084_v22  ;;  %v18_v22 = vld [vmem:[%s3768_s1 + $0x38] sm:$0xff] }
 0x172   :  { %v261_v25 = vadd.f32 1.0, %v3086_v23  ;;  %v19_v23 = vld [vmem:[%s3768_s1 + $0x40] sm:$0xff] }
 0x173   :  { %3091 = vrcp.f32 %v262_v24  ;;  %v20_v24 = vld [vmem:[%s3768_s1 + $0x48] sm:$0xff] }
 0x174   :  { %3093 = vrcp.f32 %v261_v25  ;;  %v2938_v25 = vpack.c.bf16 %v19_v23, %v18_v22 }
 0x175   :  { %v3088_v26 = vpop.eup %3087 }
 0x176   :  { %v3090_v27 = vpop.eup %3089  ;;  %287 = vrot.lane.b32.xlu1 %v3088_v26, %s3212_s24  ;;  %v21_v26 = vld [vmem:[%s3768_s1 + $0x50] sm:$0xff]  ;;  %2939 = vmatprep.subr.bf16.mxu0 %v2938_v25 }
 0x177   :  { %285 = vrot.lane.b32.xlu0 %v3090_v27, %s3212_s24  ;;  %v2942_v27 = vpack.c.bf16 %v21_v26, %v20_v24  ;;  %2941 = vmatpush3.bf16.msra.mxu0 %v2938_v25 }
 0x179   :  { %2943 = vmatprep.subr.bf16.mxu0 %v2942_v27 }
 0x17b   :  { %2945 = vmatpush3.bf16.msra.mxu0 %v2942_v27 }
 0x17d   :  { %v3092_v28 = vpop.eup %3091 }
 0x17e   :  { %v3094_v29 = vpop.eup %3093  ;;  %291 = vrot.lane.b32.xlu1 %v3092_v28, %s3212_s24  ;;  %v365_v28 = vsub.s32 1, %v3290_v53 }
 0x17f   :  { %289 = vrot.lane.b32.xlu0 %v3094_v29, %s3212_s24 }
 0x180   :  { %v366_v29 = vrot.slane %v3296_v55, %v365_v28 }
 0x1e0   :  { %v284_v36 = vpop.permute.xlu1 %283 }
 0x1e1   :  { %v300_v37 = vmul.f32 %v284_v36, %v3299_v58  ;;  %v282_v38 = vpop.permute.xlu0 %281 }
 0x1e2   :  { %v299_v39 = vmul.f32 %v282_v38, %v3301_v60 }
 0x1e3   :  { %v312_v40 = vrot.slane %v300_v37, 6  ;;  %v333_v48 = vrot.slane %v300_v37, 4 }
 0x1e4   :  { %v311_v42 = vrot.slane %v299_v39, 6 }
 0x1e6   :  { %v313_v43 = vsel %vm310_vm7, %v311_v42, %v312_v40 }
 0x1e7   :  { %320 = vrot.lane.b32.xlu0 %v313_v43, %s3213_s7 }
 0x1e8   :  { %v288_v44 = vpop.permute.xlu1 %287 }
 0x1e9   :  { %v286_v45 = vpop.permute.xlu0 %285  ;;  %v302_v46 = vmul.f32 %v288_v44, %v3305_v0 }
 0x1ea   :  { %v301_v47 = vmul.f32 %v286_v45, %v3307_v3 }
 0x1eb   :  { %v316_v51 = vrot.slane %v302_v46, 6  ;;  %v336_v52 = vrot.slane %v302_v46, 4 }
 0x1ec   :  { %v314_v49 = vrot.slane %v301_v47, 6  ;;  %v334_v50 = vrot.slane %v301_v47, 4 }
 0x1ee   :  { %v335_v54 = vsel %vm75_vm0, %v333_v48, %v334_v50  ;;  %v315_v56 = vsel %vm310_vm7, %v312_v40, %v314_v49  ;;  %v317_v61 = vsel %vm310_vm7, %v314_v49, %v316_v51  ;;  %v337_v62 = vsel %vm75_vm0, %v334_v50, %v336_v52  ;;  %v23_v48 = vld [vmem:[%s3768_s1 + $0x60] sm:$0xff]  ;;  %v24_v49 = vld [vmem:[%s3768_s1 + $0x68] sm:$0xff] }
 0x1ef   :  { %342 = vrot.lane.b32.xlu0 %v335_v54, %s3214_s8  ;;  %322 = vrot.lane.b32.xlu1 %v315_v56, %s3213_s7 }
 0x1f0   :  { %v292_v57 = vpop.permute.xlu1 %291 }
 0x1f1   :  { %v290_v58 = vpop.permute.xlu0 %289  ;;  %v304_v59 = vmul.f32 %v292_v57, %v3311_v11  ;;  %v25_v57 = vld [vmem:[%s3768_s1 + $0x70] sm:$0xff] }
 0x1f2   :  { %v303_v60 = vmul.f32 %v290_v58, %v3313_v13  ;;  %v26_v58 = vld [vmem:[%s3768_s1 + $0x78] sm:$0xff] }
 0x1f3   :  { %324 = vrot.lane.b32.xlu0 %v317_v61, %s3213_s7  ;;  %344 = vrot.lane.b32.xlu1 %v337_v62, %s3214_s8  ;;  %v340_v2 = vrot.slane %v304_v59, 4  ;;  %v3401_v59 = vpack.c.bf16 %v26_v58, %v25_v57  ;;  %v698_v62 = vsub.s32 3, %v3290_v53 }
 0x1f4   :  { %v318_v63 = vrot.slane %v303_v60, 6  ;;  %v338_v0 = vrot.slane %v303_v60, 4 }
 0x1f6   :  { %v339_v3 = vsel %vm75_vm0, %v336_v52, %v338_v0  ;;  %v319_v4 = vsel %vm310_vm7, %v316_v51, %v318_v63  ;;  %v341_v5 = vsel %vm75_vm0, %v338_v0, %v340_v2  ;;  %v3391_v51 = vpack.c.bf16 %v24_v49, %v23_v48 }
 0x1f7   :  { %346 = vrot.lane.b32.xlu0 %v339_v3, %s3214_s8  ;;  %326 = vrot.lane.b32.xlu1 %v319_v4, %s3213_s7  ;;  %v699_v2 = vrot.slane %v3296_v55, %v698_v62 }
 0x1fb   :  { %348 = vrot.lane.b32.xlu1 %v341_v5, %s3214_s8 }
 0x259   :  { %v321_v6 = vpop.permute.xlu0 %320 }
 0x25a   :  { %v354_v7 = vsel %vm122_vm6, %v299_v39, %v321_v6 }
 0x261   :  { %v323_v8 = vpop.permute.xlu1 %322  ;;  %v343_v9 = vpop.permute.xlu0 %342 }
 0x262   :  { %v359_v10 = vsel %vm358_vm8, %v354_v7, %v343_v9  ;;  %v355_v11 = vsel %vm122_vm6, %v300_v37, %v323_v8 }
 0x263   :  { %2702 = vmatprep.mubr.msk.f32.mxu1 %vm367_vm9, %v359_v10 }
 0x265   :  { %v345_v12 = vpop.permute.xlu1 %344  ;;  %v325_v13 = vpop.permute.xlu0 %324 }
 0x266   :  { %v360_v14 = vsel %vm358_vm8, %v355_v11, %v345_v12  ;;  %v356_v15 = vsel %vm122_vm6, %v301_v47, %v325_v13  ;;  %v3215_v47 = vmov 0.0|0.0   ;;  %v514_v11 = vsub.s32 2, %v3290_v53 }
 0x267   :  { %2703 = vmatmul.mubr.msk.f32.vlgmr.msra.gmra.mrb[0].mxu1 %vm367_vm9, %v360_v14  ;;  %2958 = vmatprep.subr.bf16.mxu1 %v3215_v47 }
 0x268   :  { %2960 = vmatpush3.bf16.msra.mxu1 %v3391_v51  ;;  %v515_v12 = vrot.slane %v3296_v55, %v514_v11 }
 0x269   :  { %v327_v16 = vpop.permute.xlu1 %326  ;;  %v347_v17 = vpop.permute.xlu0 %346  ;;  %2961 = vmatprep.subr.bf16.mxu1 %v3215_v47 }
 0x26a   :  { %v361_v18 = vsel %vm358_vm8, %v356_v15, %v347_v17  ;;  %v357_v19 = vsel %vm122_vm6, %v302_v46, %v327_v16  ;;  %v22_v46 = vld [vmem:[%s3768_s1 + $0x58] sm:$0xf] }
 0x26b   :  { %2705 = vmatprep.mubr.msk.f32.mxu1 %vm367_vm9, %v361_v18  ;;  %2716 = vmatprep.subr.msk.mxu0 %vm75_vm0, %v22_v46 }
 0x26c   :  { %2717 = vmatpush3.msk.msra.mxu0 %vm75_vm0, %v22_v46  ;;  %2963 = vmatpush3.bf16.msra.mxu1 %v3401_v59 }
 0x26d   :  { %v349_v20 = vpop.permute.xlu1 %348  ;;  %2946 = vmatprep.subr.bf16.mxu0 %v3215_v47  ;;  %2970 = vmatprep.subr.bf16.mxu1 %v3215_v47 }
 0x26e   :  { %v362_v21 = vsel %vm358_vm8, %v357_v19, %v349_v20 }
 0x26f   :  { %2706 = vmatmul.mubr.msk.f32.gmra.mrb[2].mxu1 %vm367_vm9, %v362_v21 }
 0x270   :  { %2754 = vmatprep.mubr.msk.f32.mxu1 %vm3217_vm10, %v3208_v1 }
 0x33a   :  { %v2704_v30 = vpop.f32.mrb[0].mxu1 }
 0x33b   :  { %v455_v31 = vadd.f32 %v2704_v30, %v366_v29  ;;  %v449_v32 = vpop.f32.mrb[1].mxu1 }
 0x33c   :  { %v450_v33 = vadd.f32 %v449_v32, %v366_v29 }
 0x33d   :  { %v2516_v34 = vmul.f32 -1.442695, %v455_v31 }
 0x33e   :  { %v2515_v35 = vmul.f32 -1.442695, %v450_v33 }
 0x33f   :  { %3095 = vpow2.f32 %v2516_v34 }
 0x340   :  { %3097 = vpow2.f32 %v2515_v35 }
 0x342   :  { %v2707_v36 = vpop.f32.mrb[2].mxu1 }
 0x343   :  { %v465_v37 = vadd.f32 %v2707_v36, %v366_v29  ;;  %v459_v38 = vpop.f32.mrb[3].mxu1 }
 0x344   :  { %v460_v39 = vadd.f32 %v459_v38, %v366_v29 }
 0x345   :  { %v2518_v40 = vmul.f32 -1.442695, %v465_v37 }
 0x346   :  { %v2517_v41 = vmul.f32 -1.442695, %v460_v39 }
 0x347   :  { %3099 = vpow2.f32 %v2518_v40 }
 0x348   :  { %3101 = vpow2.f32 %v2517_v41 }
 0x349   :  { %v3096_v42 = vpop.eup %3095 }
 0x34a   :  { %v3098_v43 = vpop.eup %3097  ;;  %v481_v44 = vadd.f32 1.0, %v3096_v42 }
 0x34b   :  { %v480_v45 = vadd.f32 1.0, %v3098_v43 }
 0x34c   :  { %3103 = vrcp.f32 %v481_v44 }
 0x34d   :  { %3105 = vrcp.f32 %v480_v45 }
 0x351   :  { %v3100_v50 = vpop.eup %3099 }
 0x352   :  { %v3102_v52 = vpop.eup %3101  ;;  %v483_v54 = vadd.f32 1.0, %v3100_v50 }
 0x353   :  { %v482_v56 = vadd.f32 1.0, %v3102_v52 }
 0x354   :  { %3107 = vrcp.f32 %v483_v54 }
 0x355   :  { %3109 = vrcp.f32 %v482_v56 }
 0x356   :  { %v3104_v60 = vpop.eup %3103 }
 0x357   :  { %v3106_v61 = vpop.eup %3105  ;;  %498 = vrot.lane.b32.xlu1 %v3104_v60, %s3216_s26 }
 0x358   :  { %496 = vrot.lane.b32.xlu0 %v3106_v61, %s3216_s26 }
 0x35e   :  { %v3108_v63 = vpop.eup %3107 }
 0x35f   :  { %v3110_v0 = vpop.eup %3109  ;;  %502 = vrot.lane.b32.xlu1 %v3108_v63, %s3216_s26 }
 0x360   :  { %500 = vrot.lane.b32.xlu0 %v3110_v0, %s3216_s26 }
 0x364   :  { %701 = vrot.lane.b32.xlu0 %v699_v2, %s3218_s27 }
 0x3c9   :  { %v499_v3 = vpop.permute.xlu1 %498 }
 0x3ca   :  { %v497_v4 = vpop.permute.xlu0 %496  ;;  %v3412_v6 = vmul.f32 %v499_v3, %v455_v31 }
 0x3cb   :  { %v3410_v5 = vmul.f32 %v497_v4, %v450_v33 }
 0x3cd   :  { %2718 = vmatprep.mubr.msk.f32.mxu0 %vm367_vm9, %v3410_v5 }
 0x3ce   :  { %2719 = vmatmul.mubr.msk.f32.vlgmr.msra.gmra.mrb[6].mxu0 %vm367_vm9, %v3412_v6 }
 0x3cf   :  { %2948 = vmatpush3.bf16.msra.mxu0 %v3391_v51 }
 0x3d0   :  { %2949 = vmatprep.subr.bf16.mxu0 %v3215_v47 }
 0x3d1   :  { %v503_v7 = vpop.permute.xlu1 %502 }
 0x3d2   :  { %v501_v8 = vpop.permute.xlu0 %500  ;;  %v3423_v10 = vmul.f32 %v503_v7, %v465_v37 }
 0x3d3   :  { %v3420_v9 = vmul.f32 %v501_v8, %v460_v39  ;;  %2951 = vmatpush3.bf16.msra.mxu0 %v3401_v59 }
 0x3d4   :  { %2952 = vmatprep.subr.bf16.mxu0 %v3215_v47 }
 0x3d5   :  { %2721 = vmatprep.mubr.msk.f32.mxu0 %vm367_vm9, %v3420_v9 }
 0x3d6   :  { %2722 = vmatmul.mubr.msk.f32.gmra.mrb[8].mxu0 %vm367_vm9, %v3423_v10  ;;  %v3447_v20 = vpop.permute.xlu0 %701 }
 0x3d7   :  { %2732 = vmatprep.mubr.msk.f32.mxu0 %vm3217_vm10, %v3208_v1 }
 0x3da   :  { %2733 = vmatmul.mubr.f32.vlgmr.msra.gmra.mrb[10].mxu0 %v3208_v1 }
 0x3db   :  { %2954 = vmatpush3.bf16.msra.mxu0 %v3391_v51  ;;  %2743 = vmatprep.mubr.msk.f32.mxu0 %vm3217_vm10, %v3208_v1 }
 0x3dc   :  { %2955 = vmatprep.subr.bf16.mxu0 %v3215_v47 }
 0x3df   :  { %2957 = vmatpush3.bf16.msra.mxu0 %v3401_v59 }
 0x3e0   :  { %2964 = vmatprep.subr.bf16.mxu0 %v3215_v47 }
 0x4a1   :  { %v2720_v13 = vpop.f32.mrb[6].mxu0 }
 0x4a2   :  { %v3441_v14 = vadd.f32 %v2720_v13, %v515_v12  ;;  %v597_v15 = vpop.f32.mrb[7].mxu0 }
 0x4a3   :  { %v3451_v24 = vadd.f32 %v597_v15, %v515_v12 }
 0x4a9   :  { %v2723_v16 = vpop.f32.mrb[8].mxu0 }
 0x4aa   :  { %v3443_v17 = vadd.f32 %v2723_v16, %v515_v12  ;;  %v607_v18 = vpop.f32.mrb[9].mxu0 }
 0x4ab   :  { %v3445_v19 = vadd.f32 %v607_v18, %v515_v12 }
 0x4ad   :  { %v685_v21 = vpop.f32.mrb[10].mxu0 }
 0x4ae   :  { %v2734_v22 = vpop.f32.mrb[11].mxu0  ;;  %v704_v23 = vadd.f32 %v3447_v20, %v685_v21  ;;  %v689_v55 = vadd.f32 %v685_v21, %v3451_v24 }
 0x4b0   :  { %706 = vrot.lane.b32.xlu1 %v704_v23, %s3218_s27  ;;  %v2524_v25 = vmul.f32 -1.442695, %v689_v55 }
 0x4b2   :  { %3111 = vpow2.f32 %v2524_v25 }
 0x4bc   :  { %v3112_v26 = vpop.eup %3111 }
 0x4bd   :  { %v693_v27 = vadd.f32 1.0, %v3112_v26 }
 0x4bf   :  { %3113 = vrcp.f32 %v693_v27 }
 0x4c9   :  { %v3114_v28 = vpop.eup %3113 }
 0x4ca   :  { %v716_v34 = vsub.f32 1.0, %v3114_v28  ;;  %v722_v36 = vmul.f32 0.0, %v3114_v28 }
 0x522   :  { %v707_v29 = vpop.permute.xlu1 %706 }
 0x523   :  { %v709_v30 = vmul.f32 %v3114_v28, %v707_v29 }
 0x525   :  { %711 = vrot.lane.b32.xlu0 %v709_v30, %s3218_s27 }
 0x597   :  { %v712_v31 = vpop.permute.xlu0 %711 }
 0x598   :  { %v714_v32 = vadd.f32 %v712_v31, %v3451_v24 }
 0x59a   :  { %3115 = vtanh.f32 %v714_v32 }
 0x5a4   :  { %v3116_v33 = vpop.eup %3115 }
 0x5a5   :  { %718 = vrot.lane.b32.xlu1 %v3116_v33, %s3219_s28 }
 0x617   :  { %v719_v35 = vpop.permute.xlu1 %718 }
 0x618   :  { %v721_v37 = vmul.f32 %v719_v35, %v716_v34 }
 0x61a   :  { %v3457_v38 = vadd.f32 %v722_v36, %v721_v37 }
 0x61c   :  { %725 = vrot.lane.b32.xlu0 %v3457_v38, %s3219_s28  ;;  %v828_v61 = vrot.slane %v3457_v38, 6 }
 0x68e   :  { %v726_v39 = vpop.permute.xlu0 %725 }
 0x68f   :  { %2744 = vmatmul.mubr.msk.f32.vlgmr.msra.gmra.mrb[12].mxu0 %vm616_vm11, %v726_v39 }
 0x690   :  { %2966 = vmatpush3.bf16.msra.mxu0 %v3391_v51  ;;  %2765 = vmatprep.mubr.msk.f32.mxu0 %vm3217_vm10, %v3208_v1 }
 0x691   :  { %2967 = vmatprep.subr.bf16.mxu0 %v3215_v47 }
 0x694   :  { %2969 = vmatpush3.bf16.msra.mxu0 %v3401_v59 }
 0x695   :  { %2976 = vmatprep.subr.bf16.mxu0 %v3215_v47 }
 0x762   :  { %v795_v40 = vpop.f32.mrb[12].mxu0 }
 0x763   :  { %v809_v41 = vadd.f32 %v795_v40, %v3447_v20  ;;  %v2745_v42 = vpop.f32.mrb[13].mxu0  ;;  %v800_v44 = vrot.slane %v795_v40, 6 }
 0x765   :  { %v811_v43 = vrot.slane %v809_v41, 6  ;;  %v802_v45 = vadd.f32 %v800_v44, %v3451_v24 }
 0x767   :  { %812 = vrot.lane.b32.xlu1 %v811_v43, %s3218_s27  ;;  %v2526_v46 = vmul.f32 -1.442695, %v802_v45 }
 0x769   :  { %3117 = vpow2.f32 %v2526_v46 }
 0x773   :  { %v3118_v48 = vpop.eup %3117 }
 0x774   :  { %v806_v49 = vadd.f32 1.0, %v3118_v48 }
 0x776   :  { %3119 = vrcp.f32 %v806_v49 }
 0x780   :  { %v3120_v50 = vpop.eup %3119 }
 0x781   :  { %v822_v60 = vsub.f32 1.0, %v3120_v50  ;;  %v830_v0 = vmul.f32 %v3120_v50, %v828_v61 }
 0x7d9   :  { %v813_v52 = vpop.permute.xlu1 %812 }
 0x7da   :  { %v815_v54 = vmul.f32 %v3120_v50, %v813_v52 }
 0x7dc   :  { %817 = vrot.lane.b32.xlu0 %v815_v54, %s3218_s27 }
 0x84e   :  { %v818_v56 = vpop.permute.xlu0 %817 }
 0x84f   :  { %v820_v57 = vadd.f32 %v818_v56, %v3451_v24 }
 0x851   :  { %3121 = vtanh.f32 %v820_v57 }
 0x85b   :  { %v3122_v58 = vpop.eup %3121 }
 0x85c   :  { %824 = vrot.lane.b32.xlu1 %v3122_v58, %s3219_s28 }
 0x8ce   :  { %v825_v62 = vpop.permute.xlu1 %824 }
 0x8cf   :  { %v827_v63 = vmul.f32 %v825_v62, %v822_v60 }
 0x8d1   :  { %v831_v2 = vadd.f32 %v830_v0, %v827_v63 }
 0x8d3   :  { %v833_v3 = vrot.slane %v831_v2, 2  ;;  %v937_v29 = vrot.slane %v831_v2, 6  ;;  %v2340_v34 = vsel %vm310_vm7, %v3457_v38, %v831_v2 }
 0x8d5   :  { %834 = vrot.lane.b32.xlu0 %v833_v3, %s3219_s28 }
 0x947   :  { %v835_v4 = vpop.permute.xlu0 %834 }
 0x948   :  { %2755 = vmatmul.mubr.msk.f32.vlgmr.msra.gmra.mrb[4].mxu1 %vm616_vm11, %v835_v4 }
 0x949   :  { %2972 = vmatpush3.bf16.msra.mxu1 %v3391_v51  ;;  %2776 = vmatprep.mubr.msk.f32.mxu1 %vm3217_vm10, %v3208_v1 }
 0x94a   :  { %2973 = vmatprep.subr.bf16.mxu1 %v3215_v47 }
 0x94d   :  { %2975 = vmatpush3.bf16.msra.mxu1 %v3401_v59 }
 0x94e   :  { %2982 = vmatprep.subr.bf16.mxu1 %v3215_v47 }
 0xa1b   :  { %v904_v7 = vpop.f32.mrb[4].mxu1 }
 0xa1c   :  { %v918_v8 = vadd.f32 %v904_v7, %v3447_v20  ;;  %v2756_v11 = vpop.f32.mrb[5].mxu1  ;;  %v909_v13 = vrot.slane %v904_v7, 4 }
 0xa1e   :  { %v920_v12 = vrot.slane %v918_v8, 4  ;;  %v911_v15 = vadd.f32 %v909_v13, %v3451_v24 }
 0xa20   :  { %921 = vrot.lane.b32.xlu1 %v920_v12, %s3218_s27  ;;  %v2528_v16 = vmul.f32 -1.442695, %v911_v15 }
 0xa22   :  { %3123 = vpow2.f32 %v2528_v16 }
 0xa2c   :  { %v3124_v18 = vpop.eup %3123 }
 0xa2d   :  { %v915_v21 = vadd.f32 1.0, %v3124_v18 }
 0xa2f   :  { %3125 = vrcp.f32 %v915_v21 }
 0xa39   :  { %v3126_v22 = vpop.eup %3125 }
 0xa3a   :  { %v931_v28 = vsub.f32 1.0, %v3126_v22  ;;  %v939_v31 = vmul.f32 %v3126_v22, %v937_v29 }
 0xa92   :  { %v922_v23 = vpop.permute.xlu1 %921 }
 0xa93   :  { %v924_v55 = vmul.f32 %v3126_v22, %v922_v23 }
 0xa95   :  { %926 = vrot.lane.b32.xlu0 %v924_v55, %s3218_s27 }
 0xb07   :  { %v927_v25 = vpop.permute.xlu0 %926 }
 0xb08   :  { %v929_v26 = vadd.f32 %v927_v25, %v3451_v24 }
 0xb0a   :  { %3127 = vtanh.f32 %v929_v26 }
 0xb14   :  { %v3128_v27 = vpop.eup %3127 }
 0xb15   :  { %933 = vrot.lane.b32.xlu1 %v3128_v27, %s3219_s28 }
 0xb87   :  { %v934_v30 = vpop.permute.xlu1 %933 }
 0xb88   :  { %v936_v32 = vmul.f32 %v934_v30, %v931_v28 }
 0xb8a   :  { %v940_v33 = vadd.f32 %v939_v31, %v936_v32 }
 0xb8c   :  { %v942_v35 = vrot.slane %v940_v33, 4  ;;  %v2341_v36 = vsel %vm75_vm0, %v2340_v34, %v940_v33  ;;  %v1046_v58 = vrot.slane %v940_v33, 6 }
 0xb8e   :  { %943 = vrot.lane.b32.xlu0 %v942_v35, %s3219_s28 }
 0xc00   :  { %v944_v37 = vpop.permute.xlu0 %943 }
 0xc01   :  { %2766 = vmatmul.mubr.msk.f32.vlgmr.msra.gmra.mrb[14].mxu0 %vm616_vm11, %v944_v37 }
 0xc02   :  { %2978 = vmatpush3.bf16.msra.mxu0 %v3391_v51  ;;  %2787 = vmatprep.mubr.msk.f32.mxu0 %vm3217_vm10, %v3208_v1 }
 0xc03   :  { %2979 = vmatprep.subr.bf16.mxu0 %v3215_v47 }
 0xc06   :  { %2981 = vmatpush3.bf16.msra.mxu0 %v3401_v59 }
 0xc07   :  { %2988 = vmatprep.subr.bf16.mxu0 %v3215_v47 }
 0xcd4   :  { %v1013_v38 = vpop.f32.mrb[14].mxu0 }
 0xcd5   :  { %v1027_v39 = vadd.f32 %v1013_v38, %v3447_v20  ;;  %v2767_v40 = vpop.f32.mrb[15].mxu0  ;;  %v1018_v42 = vrot.slane %v1013_v38, 2 }
 0xcd7   :  { %v1029_v41 = vrot.slane %v1027_v39, 2  ;;  %v1020_v43 = vadd.f32 %v1018_v42, %v3451_v24 }
 0xcd9   :  { %1030 = vrot.lane.b32.xlu1 %v1029_v41, %s3218_s27  ;;  %v2530_v44 = vmul.f32 -1.442695, %v1020_v43 }
 0xcdb   :  { %3129 = vpow2.f32 %v2530_v44 }
 0xce5   :  { %v3130_v45 = vpop.eup %3129 }
 0xce6   :  { %v1024_v46 = vadd.f32 1.0, %v3130_v45 }
 0xce8   :  { %3131 = vrcp.f32 %v1024_v46 }
 0xcf2   :  { %v3132_v48 = vpop.eup %3131 }
 0xcf3   :  { %v1040_v57 = vsub.f32 1.0, %v3132_v48  ;;  %v1048_v61 = vmul.f32 %v3132_v48, %v1046_v58 }
 0xd4b   :  { %v1031_v49 = vpop.permute.xlu1 %1030 }
 0xd4c   :  { %v1033_v50 = vmul.f32 %v3132_v48, %v1031_v49 }
 0xd4e   :  { %1035 = vrot.lane.b32.xlu0 %v1033_v50, %s3218_s27 }
 0xdc0   :  { %v1036_v52 = vpop.permute.xlu0 %1035 }
 0xdc1   :  { %v1038_v54 = vadd.f32 %v1036_v52, %v3451_v24 }
 0xdc3   :  { %3133 = vtanh.f32 %v1038_v54 }
 0xdcd   :  { %v3134_v56 = vpop.eup %3133 }
 0xdce   :  { %1042 = vrot.lane.b32.xlu1 %v3134_v56, %s3219_s28 }
 0xe40   :  { %v1043_v60 = vpop.permute.xlu1 %1042 }
 0xe41   :  { %v1045_v62 = vmul.f32 %v1043_v60, %v1040_v57 }
 0xe43   :  { %v1049_v63 = vadd.f32 %v1048_v61, %v1045_v62 }
 0xe45   :  { %v1051_v0 = vrot.slane %v1049_v63, 6  ;;  %v3507_v2 = vsel %vm46_vm1, %v2341_v36, %v1049_v63 }
 0xe47   :  { %1052 = vrot.lane.b32.xlu0 %v1051_v0, %s3219_s28 }
 0xeb9   :  { %v1053_v3 = vpop.permute.xlu0 %1052 }
 0xeba   :  { %2777 = vmatmul.mubr.msk.f32.vlgmr.msra.gmra.mrb[6].mxu1 %vm616_vm11, %v1053_v3 }
 0xebb   :  { %2984 = vmatpush3.bf16.msra.mxu1 %v3391_v51  ;;  %2798 = vmatprep.mubr.msk.f32.mxu1 %vm3217_vm10, %v3208_v1 }
 0xebc   :  { %2985 = vmatprep.subr.bf16.mxu1 %v3215_v47 }
 0xebf   :  { %2987 = vmatpush3.bf16.msra.mxu1 %v3401_v59 }
 0xec0   :  { %2994 = vmatprep.subr.bf16.mxu1 %v3215_v47 }
 0xf8d   :  { %v1122_v24 = vpop.f32.mrb[6].mxu1 }
 0xf8e   :  { %v1133_v4 = vadd.f32 %v1122_v24, %v3447_v20  ;;  %v2778_v7 = vpop.f32.mrb[7].mxu1  ;;  %v1126_v8 = vadd.f32 %v1122_v24, %v3441_v14 }
 0xf90   :  { %1135 = vrot.lane.b32.xlu1 %v1133_v4, %s3218_s27  ;;  %v2532_v11 = vmul.f32 -1.442695, %v1126_v8 }
 0xf92   :  { %3135 = vpow2.f32 %v2532_v11 }
 0xf9c   :  { %v3136_v12 = vpop.eup %3135 }
 0xf9d   :  { %v1130_v13 = vadd.f32 1.0, %v3136_v12 }
 0xf9f   :  { %3137 = vrcp.f32 %v1130_v13 }
 0xfa9   :  { %v3138_v15 = vpop.eup %3137 }
 0xfaa   :  { %v1145_v55 = vsub.f32 1.0, %v3138_v15  ;;  %v1152_v26 = vmul.f32 %v3138_v15, %v1051_v0 }
0x1002   :  { %v1136_v16 = vpop.permute.xlu1 %1135 }
0x1003   :  { %v1138_v18 = vmul.f32 %v3138_v15, %v1136_v16 }
0x1005   :  { %1140 = vrot.lane.b32.xlu0 %v1138_v18, %s3218_s27 }
0x1077   :  { %v1141_v21 = vpop.permute.xlu0 %1140 }
0x1078   :  { %v1143_v22 = vadd.f32 %v1141_v21, %v3441_v14 }
0x107a   :  { %3139 = vtanh.f32 %v1143_v22 }
0x1084   :  { %v3140_v23 = vpop.eup %3139 }
0x1085   :  { %1147 = vrot.lane.b32.xlu1 %v3140_v23, %s3219_s28 }
0x10f7   :  { %v1148_v25 = vpop.permute.xlu1 %1147 }
0x10f8   :  { %v1150_v27 = vmul.f32 %v1148_v25, %v1145_v55 }
0x10fa   :  { %v3523_v28 = vadd.f32 %v1152_v26, %v1150_v27 }
0x10fc   :  { %1155 = vrot.lane.b32.xlu0 %v3523_v28, %s3219_s28  ;;  %v1258_v46 = vrot.slane %v3523_v28, 6 }
0x116e   :  { %v1156_v29 = vpop.permute.xlu0 %1155 }
0x116f   :  { %2788 = vmatmul.mubr.msk.f32.vlgmr.msra.gmra.mrb[16].mxu0 %vm616_vm11, %v1156_v29 }
0x1170   :  { %2990 = vmatpush3.bf16.msra.mxu0 %v3391_v51  ;;  %2809 = vmatprep.mubr.msk.f32.mxu0 %vm3217_vm10, %v3208_v1 }
0x1171   :  { %2991 = vmatprep.subr.bf16.mxu0 %v3215_v47 }
0x1174   :  { %2993 = vmatpush3.bf16.msra.mxu0 %v3401_v59 }
0x1175   :  { %3000 = vmatprep.subr.bf16.mxu0 %v3215_v47 }
0x1242   :  { %v1225_v30 = vpop.f32.mrb[16].mxu0 }
0x1243   :  { %v1239_v31 = vadd.f32 %v1225_v30, %v3447_v20  ;;  %v2789_v32 = vpop.f32.mrb[17].mxu0  ;;  %v1230_v34 = vrot.slane %v1225_v30, 6 }
0x1245   :  { %v1241_v33 = vrot.slane %v1239_v31, 6  ;;  %v1232_v35 = vadd.f32 %v1230_v34, %v3441_v14 }
0x1247   :  { %1242 = vrot.lane.b32.xlu1 %v1241_v33, %s3218_s27  ;;  %v2534_v36 = vmul.f32 -1.442695, %v1232_v35 }
0x1249   :  { %3141 = vpow2.f32 %v2534_v36 }
0x1253   :  { %v3142_v37 = vpop.eup %3141 }
0x1254   :  { %v1236_v38 = vadd.f32 1.0, %v3142_v37 }
0x1256   :  { %3143 = vrcp.f32 %v1236_v38 }
0x1260   :  { %v3144_v39 = vpop.eup %3143 }
0x1261   :  { %v1252_v45 = vsub.f32 1.0, %v3144_v39  ;;  %v1260_v50 = vmul.f32 %v3144_v39, %v1258_v46 }
0x12b9   :  { %v1243_v40 = vpop.permute.xlu1 %1242 }
0x12ba   :  { %v1245_v41 = vmul.f32 %v3144_v39, %v1243_v40 }
0x12bc   :  { %1247 = vrot.lane.b32.xlu0 %v1245_v41, %s3218_s27 }
0x132e   :  { %v1248_v42 = vpop.permute.xlu0 %1247 }
0x132f   :  { %v1250_v43 = vadd.f32 %v1248_v42, %v3441_v14 }
0x1331   :  { %3145 = vtanh.f32 %v1250_v43 }
0x133b   :  { %v3146_v44 = vpop.eup %3145 }
0x133c   :  { %1254 = vrot.lane.b32.xlu1 %v3146_v44, %s3219_s28 }
0x13ae   :  { %v1255_v48 = vpop.permute.xlu1 %1254 }
0x13af   :  { %v1257_v49 = vmul.f32 %v1255_v48, %v1252_v45 }
0x13b1   :  { %v1261_v52 = vadd.f32 %v1260_v50, %v1257_v49 }
0x13b3   :  { %v1263_v54 = vrot.slane %v1261_v52, 2  ;;  %v1367_v16 = vrot.slane %v1261_v52, 6  ;;  %v2343_v55 = vsel %vm310_vm7, %v3523_v28, %v1261_v52 }
0x13b5   :  { %1264 = vrot.lane.b32.xlu0 %v1263_v54, %s3219_s28 }
0x1427   :  { %v1265_v56 = vpop.permute.xlu0 %1264 }
0x1428   :  { %2799 = vmatmul.mubr.msk.f32.vlgmr.msra.gmra.mrb[8].mxu1 %vm616_vm11, %v1265_v56 }
0x1429   :  { %2996 = vmatpush3.bf16.msra.mxu1 %v3391_v51  ;;  %2820 = vmatprep.mubr.msk.f32.mxu1 %vm3217_vm10, %v3208_v1 }
0x142a   :  { %2997 = vmatprep.subr.bf16.mxu1 %v3215_v47 }
0x142d   :  { %2999 = vmatpush3.bf16.msra.mxu1 %v3401_v59 }
0x142e   :  { %3006 = vmatprep.subr.bf16.mxu1 %v3215_v47 }
0x14fb   :  { %v1334_v57 = vpop.f32.mrb[8].mxu1 }
0x14fc   :  { %v1348_v58 = vadd.f32 %v1334_v57, %v3447_v20  ;;  %v2800_v60 = vpop.f32.mrb[9].mxu1  ;;  %v1339_v62 = vrot.slane %v1334_v57, 4 }
0x14fe   :  { %v1350_v61 = vrot.slane %v1348_v58, 4  ;;  %v1341_v63 = vadd.f32 %v1339_v62, %v3441_v14 }
0x1500   :  { %1351 = vrot.lane.b32.xlu1 %v1350_v61, %s3218_s27  ;;  %v2536_v0 = vmul.f32 -1.442695, %v1341_v63 }
0x1502   :  { %3147 = vpow2.f32 %v2536_v0 }
0x150c   :  { %v3148_v3 = vpop.eup %3147 }
0x150d   :  { %v1345_v24 = vadd.f32 1.0, %v3148_v3 }
0x150f   :  { %3149 = vrcp.f32 %v1345_v24 }
0x1519   :  { %v3150_v4 = vpop.eup %3149 }
0x151a   :  { %v1361_v15 = vsub.f32 1.0, %v3150_v4  ;;  %v1369_v21 = vmul.f32 %v3150_v4, %v1367_v16 }
0x1572   :  { %v1352_v7 = vpop.permute.xlu1 %1351 }
0x1573   :  { %v1354_v8 = vmul.f32 %v3150_v4, %v1352_v7 }
0x1575   :  { %1356 = vrot.lane.b32.xlu0 %v1354_v8, %s3218_s27 }
0x15e7   :  { %v1357_v11 = vpop.permute.xlu0 %1356 }
0x15e8   :  { %v1359_v12 = vadd.f32 %v1357_v11, %v3441_v14 }
0x15ea   :  { %3151 = vtanh.f32 %v1359_v12 }
0x15f4   :  { %v3152_v13 = vpop.eup %3151 }
0x15f5   :  { %1363 = vrot.lane.b32.xlu1 %v3152_v13, %s3219_s28 }
0x1667   :  { %v1364_v18 = vpop.permute.xlu1 %1363 }
0x1668   :  { %v1366_v22 = vmul.f32 %v1364_v18, %v1361_v15 }
0x166a   :  { %v1370_v23 = vadd.f32 %v1369_v21, %v1366_v22 }
0x166c   :  { %v1372_v25 = vrot.slane %v1370_v23, 4  ;;  %v2344_v26 = vsel %vm75_vm0, %v2343_v55, %v1370_v23  ;;  %v1476_v44 = vrot.slane %v1370_v23, 6 }
0x166e   :  { %1373 = vrot.lane.b32.xlu0 %v1372_v25, %s3219_s28 }
0x16e0   :  { %v1374_v27 = vpop.permute.xlu0 %1373 }
0x16e1   :  { %2810 = vmatmul.mubr.msk.f32.vlgmr.msra.gmra.mrb[18].mxu0 %vm616_vm11, %v1374_v27 }
0x16e2   :  { %3002 = vmatpush3.bf16.msra.mxu0 %v3391_v51  ;;  %2831 = vmatprep.mubr.msk.f32.mxu0 %vm3217_vm10, %v3208_v1 }
0x16e3   :  { %3003 = vmatprep.subr.bf16.mxu0 %v3215_v47 }
0x16e6   :  { %3005 = vmatpush3.bf16.msra.mxu0 %v3401_v59 }
0x16e7   :  { %3012 = vmatprep.subr.bf16.mxu0 %v3215_v47 }
0x17b4   :  { %v1443_v28 = vpop.f32.mrb[18].mxu0 }
0x17b5   :  { %v1457_v29 = vadd.f32 %v1443_v28, %v3447_v20  ;;  %v2811_v30 = vpop.f32.mrb[19].mxu0  ;;  %v1448_v32 = vrot.slane %v1443_v28, 2 }
0x17b7   :  { %v1459_v31 = vrot.slane %v1457_v29, 2  ;;  %v1450_v33 = vadd.f32 %v1448_v32, %v3441_v14 }
0x17b9   :  { %1460 = vrot.lane.b32.xlu1 %v1459_v31, %s3218_s27  ;;  %v2538_v34 = vmul.f32 -1.442695, %v1450_v33 }
0x17bb   :  { %3153 = vpow2.f32 %v2538_v34 }
0x17c5   :  { %v3154_v35 = vpop.eup %3153 }
0x17c6   :  { %v1454_v36 = vadd.f32 1.0, %v3154_v35 }
0x17c8   :  { %3155 = vrcp.f32 %v1454_v36 }
0x17d2   :  { %v3156_v37 = vpop.eup %3155 }
0x17d3   :  { %v1470_v43 = vsub.f32 1.0, %v3156_v37  ;;  %v1478_v46 = vmul.f32 %v3156_v37, %v1476_v44 }
0x182b   :  { %v1461_v38 = vpop.permute.xlu1 %1460 }
0x182c   :  { %v1463_v39 = vmul.f32 %v3156_v37, %v1461_v38 }
0x182e   :  { %1465 = vrot.lane.b32.xlu0 %v1463_v39, %s3218_s27 }
0x18a0   :  { %v1466_v40 = vpop.permute.xlu0 %1465 }
0x18a1   :  { %v1468_v41 = vadd.f32 %v1466_v40, %v3441_v14 }
0x18a3   :  { %3157 = vtanh.f32 %v1468_v41 }
0x18ad   :  { %v3158_v42 = vpop.eup %3157 }
0x18ae   :  { %1472 = vrot.lane.b32.xlu1 %v3158_v42, %s3219_s28 }
0x1920   :  { %v1473_v45 = vpop.permute.xlu1 %1472 }
0x1921   :  { %v1475_v48 = vmul.f32 %v1473_v45, %v1470_v43 }
0x1923   :  { %v1479_v49 = vadd.f32 %v1478_v46, %v1475_v48 }
0x1925   :  { %v1481_v50 = vrot.slane %v1479_v49, 6  ;;  %v3573_v52 = vsel %vm46_vm1, %v2344_v26, %v1479_v49 }
0x1927   :  { %1482 = vrot.lane.b32.xlu0 %v1481_v50, %s3219_s28 }
0x1999   :  { %v1483_v54 = vpop.permute.xlu0 %1482 }
0x199a   :  { %2821 = vmatmul.mubr.msk.f32.vlgmr.msra.gmra.mrb[10].mxu1 %vm616_vm11, %v1483_v54 }
0x199b   :  { %3008 = vmatpush3.bf16.msra.mxu1 %v3391_v51  ;;  %2842 = vmatprep.mubr.msk.f32.mxu1 %vm3217_vm10, %v3208_v1 }
0x199c   :  { %3009 = vmatprep.subr.bf16.mxu1 %v3215_v47 }
0x199f   :  { %3011 = vmatpush3.bf16.msra.mxu1 %v3401_v59 }
0x19a0   :  { %3018 = vmatprep.subr.bf16.mxu1 %v3215_v47 }
0x1a6d   :  { %v1552_v14 = vpop.f32.mrb[10].mxu1 }
0x1a6e   :  { %v1563_v56 = vadd.f32 %v1552_v14, %v3447_v20  ;;  %v2822_v57 = vpop.f32.mrb[11].mxu1  ;;  %v1556_v58 = vadd.f32 %v1552_v14, %v3445_v19 }
0x1a70   :  { %1565 = vrot.lane.b32.xlu1 %v1563_v56, %s3218_s27  ;;  %v2540_v60 = vmul.f32 -1.442695, %v1556_v58 }
0x1a72   :  { %3159 = vpow2.f32 %v2540_v60 }
0x1a7c   :  { %v3160_v61 = vpop.eup %3159 }
0x1a7d   :  { %v1560_v62 = vadd.f32 1.0, %v3160_v61 }
0x1a7f   :  { %3161 = vrcp.f32 %v1560_v62 }
0x1a89   :  { %v3162_v63 = vpop.eup %3161 }
0x1a8a   :  { %v1575_v8 = vsub.f32 1.0, %v3162_v63  ;;  %v1582_v12 = vmul.f32 %v3162_v63, %v1481_v50 }
0x1ae2   :  { %v1566_v0 = vpop.permute.xlu1 %1565 }
0x1ae3   :  { %v1568_v3 = vmul.f32 %v3162_v63, %v1566_v0 }
0x1ae5   :  { %1570 = vrot.lane.b32.xlu0 %v1568_v3, %s3218_s27 }
0x1b57   :  { %v1571_v24 = vpop.permute.xlu0 %1570 }
0x1b58   :  { %v1573_v4 = vadd.f32 %v1571_v24, %v3445_v19 }
0x1b5a   :  { %3163 = vtanh.f32 %v1573_v4 }
0x1b64   :  { %v3164_v7 = vpop.eup %3163 }
0x1b65   :  { %1577 = vrot.lane.b32.xlu1 %v3164_v7, %s3219_s28 }
0x1bd7   :  { %v1578_v11 = vpop.permute.xlu1 %1577 }
0x1bd8   :  { %v1580_v13 = vmul.f32 %v1578_v11, %v1575_v8 }
0x1bda   :  { %v3589_v15 = vadd.f32 %v1582_v12, %v1580_v13 }
0x1bdc   :  { %1585 = vrot.lane.b32.xlu0 %v3589_v15, %s3219_s28  ;;  %v1688_v36 = vrot.slane %v3589_v15, 6 }
0x1c4e   :  { %v1586_v16 = vpop.permute.xlu0 %1585 }
0x1c4f   :  { %2832 = vmatmul.mubr.msk.f32.vlgmr.msra.gmra.mrb[20].mxu0 %vm616_vm11, %v1586_v16 }
0x1c50   :  { %3014 = vmatpush3.bf16.msra.mxu0 %v3391_v51  ;;  %2853 = vmatprep.mubr.msk.f32.mxu0 %vm3217_vm10, %v3208_v1 }
0x1c51   :  { %3015 = vmatprep.subr.bf16.mxu0 %v3215_v47 }
0x1c54   :  { %3017 = vmatpush3.bf16.msra.mxu0 %v3401_v59 }
0x1c55   :  { %3024 = vmatprep.subr.bf16.mxu0 %v3215_v47 }
0x1d22   :  { %v1655_v18 = vpop.f32.mrb[20].mxu0 }
0x1d23   :  { %v1669_v21 = vadd.f32 %v1655_v18, %v3447_v20  ;;  %v2833_v22 = vpop.f32.mrb[21].mxu0  ;;  %v1660_v55 = vrot.slane %v1655_v18, 6 }
0x1d25   :  { %v1671_v23 = vrot.slane %v1669_v21, 6  ;;  %v1662_v25 = vadd.f32 %v1660_v55, %v3445_v19 }
0x1d27   :  { %1672 = vrot.lane.b32.xlu1 %v1671_v23, %s3218_s27  ;;  %v2542_v26 = vmul.f32 -1.442695, %v1662_v25 }
0x1d29   :  { %3165 = vpow2.f32 %v2542_v26 }
0x1d33   :  { %v3166_v27 = vpop.eup %3165 }
0x1d34   :  { %v1666_v28 = vadd.f32 1.0, %v3166_v27 }
0x1d36   :  { %3167 = vrcp.f32 %v1666_v28 }
0x1d40   :  { %v3168_v29 = vpop.eup %3167 }
0x1d41   :  { %v1682_v35 = vsub.f32 1.0, %v3168_v29  ;;  %v1690_v39 = vmul.f32 %v3168_v29, %v1688_v36 }
0x1d99   :  { %v1673_v30 = vpop.permute.xlu1 %1672 }
0x1d9a   :  { %v1675_v31 = vmul.f32 %v3168_v29, %v1673_v30 }
0x1d9c   :  { %1677 = vrot.lane.b32.xlu0 %v1675_v31, %s3218_s27 }
0x1e0e   :  { %v1678_v32 = vpop.permute.xlu0 %1677 }
0x1e0f   :  { %v1680_v33 = vadd.f32 %v1678_v32, %v3445_v19 }
0x1e11   :  { %3169 = vtanh.f32 %v1680_v33 }
0x1e1b   :  { %v3170_v34 = vpop.eup %3169 }
0x1e1c   :  { %1684 = vrot.lane.b32.xlu1 %v3170_v34, %s3219_s28 }
0x1e8e   :  { %v1685_v37 = vpop.permute.xlu1 %1684 }
0x1e8f   :  { %v1687_v38 = vmul.f32 %v1685_v37, %v1682_v35 }
0x1e91   :  { %v1691_v40 = vadd.f32 %v1690_v39, %v1687_v38 }
0x1e93   :  { %v1693_v41 = vrot.slane %v1691_v40, 2  ;;  %v1797_v0 = vrot.slane %v1691_v40, 6  ;;  %v2346_v8 = vsel %vm310_vm7, %v3589_v15, %v1691_v40 }
0x1e95   :  { %1694 = vrot.lane.b32.xlu0 %v1693_v41, %s3219_s28 }
0x1f07   :  { %v1695_v42 = vpop.permute.xlu0 %1694 }
0x1f08   :  { %2843 = vmatmul.mubr.msk.f32.vlgmr.msra.gmra.mrb[12].mxu1 %vm616_vm11, %v1695_v42 }
0x1f09   :  { %3020 = vmatpush3.bf16.msra.mxu1 %v3391_v51  ;;  %2864 = vmatprep.mubr.msk.f32.mxu1 %vm3217_vm10, %v3208_v1 }
0x1f0a   :  { %3021 = vmatprep.subr.bf16.mxu1 %v3215_v47 }
0x1f0d   :  { %3023 = vmatpush3.bf16.msra.mxu1 %v3401_v59 }
0x1f0e   :  { %3030 = vmatprep.subr.bf16.mxu1 %v3215_v47 }
0x1fdb   :  { %v1764_v43 = vpop.f32.mrb[12].mxu1 }
0x1fdc   :  { %v1778_v44 = vadd.f32 %v1764_v43, %v3447_v20  ;;  %v2844_v45 = vpop.f32.mrb[13].mxu1  ;;  %v1769_v48 = vrot.slane %v1764_v43, 4 }
0x1fde   :  { %v1780_v46 = vrot.slane %v1778_v44, 4  ;;  %v1771_v49 = vadd.f32 %v1769_v48, %v3445_v19 }
0x1fe0   :  { %1781 = vrot.lane.b32.xlu1 %v1780_v46, %s3218_s27  ;;  %v2544_v50 = vmul.f32 -1.442695, %v1771_v49 }
0x1fe2   :  { %3171 = vpow2.f32 %v2544_v50 }
0x1fec   :  { %v3172_v54 = vpop.eup %3171 }
0x1fed   :  { %v1775_v14 = vadd.f32 1.0, %v3172_v54 }
0x1fef   :  { %3173 = vrcp.f32 %v1775_v14 }
0x1ff9   :  { %v3174_v56 = vpop.eup %3173 }
0x1ffa   :  { %v1791_v63 = vsub.f32 1.0, %v3174_v56  ;;  %v1799_v24 = vmul.f32 %v3174_v56, %v1797_v0 }
0x2052   :  { %v1782_v57 = vpop.permute.xlu1 %1781 }
0x2053   :  { %v1784_v58 = vmul.f32 %v3174_v56, %v1782_v57 }
0x2055   :  { %1786 = vrot.lane.b32.xlu0 %v1784_v58, %s3218_s27 }
0x20c7   :  { %v1787_v60 = vpop.permute.xlu0 %1786 }
0x20c8   :  { %v1789_v61 = vadd.f32 %v1787_v60, %v3445_v19 }
0x20ca   :  { %3175 = vtanh.f32 %v1789_v61 }
0x20d4   :  { %v3176_v62 = vpop.eup %3175 }
0x20d5   :  { %1793 = vrot.lane.b32.xlu1 %v3176_v62, %s3219_s28 }
0x2147   :  { %v1794_v3 = vpop.permute.xlu1 %1793 }
0x2148   :  { %v1796_v4 = vmul.f32 %v1794_v3, %v1791_v63 }
0x214a   :  { %v1800_v7 = vadd.f32 %v1799_v24, %v1796_v4 }
0x214c   :  { %v1802_v11 = vrot.slane %v1800_v7, 4  ;;  %v2347_v12 = vsel %vm75_vm0, %v2346_v8, %v1800_v7  ;;  %v1906_v34 = vrot.slane %v1800_v7, 6 }
0x214e   :  { %1803 = vrot.lane.b32.xlu0 %v1802_v11, %s3219_s28 }
0x21c0   :  { %v1804_v13 = vpop.permute.xlu0 %1803 }
0x21c1   :  { %2854 = vmatmul.mubr.msk.f32.vlgmr.msra.gmra.mrb[22].mxu0 %vm616_vm11, %v1804_v13 }
0x21c2   :  { %3026 = vmatpush3.bf16.msra.mxu0 %v3391_v51  ;;  %2875 = vmatprep.mubr.msk.f32.mxu0 %vm3217_vm10, %v3208_v1 }
0x21c3   :  { %3027 = vmatprep.subr.bf16.mxu0 %v3215_v47 }
0x21c6   :  { %3029 = vmatpush3.bf16.msra.mxu0 %v3401_v59 }
0x21c7   :  { %3036 = vmatprep.subr.bf16.mxu0 %v3215_v47 }
0x2294   :  { %v1873_v15 = vpop.f32.mrb[22].mxu0 }
0x2295   :  { %v1887_v16 = vadd.f32 %v1873_v15, %v3447_v20  ;;  %v2855_v18 = vpop.f32.mrb[23].mxu0  ;;  %v1878_v22 = vrot.slane %v1873_v15, 2 }
0x2297   :  { %v1889_v21 = vrot.slane %v1887_v16, 2  ;;  %v1880_v23 = vadd.f32 %v1878_v22, %v3445_v19 }
0x2299   :  { %1890 = vrot.lane.b32.xlu1 %v1889_v21, %s3218_s27  ;;  %v2546_v55 = vmul.f32 -1.442695, %v1880_v23 }
0x229b   :  { %3177 = vpow2.f32 %v2546_v55 }
0x22a5   :  { %v3178_v25 = vpop.eup %3177 }
0x22a6   :  { %v1884_v26 = vadd.f32 1.0, %v3178_v25 }
0x22a8   :  { %3179 = vrcp.f32 %v1884_v26 }
0x22b2   :  { %v3180_v27 = vpop.eup %3179 }
0x22b3   :  { %v1900_v33 = vsub.f32 1.0, %v3180_v27  ;;  %v1908_v36 = vmul.f32 %v3180_v27, %v1906_v34 }
0x230b   :  { %v1891_v28 = vpop.permute.xlu1 %1890 }
0x230c   :  { %v1893_v29 = vmul.f32 %v3180_v27, %v1891_v28 }
0x230e   :  { %1895 = vrot.lane.b32.xlu0 %v1893_v29, %s3218_s27 }
0x2380   :  { %v1896_v30 = vpop.permute.xlu0 %1895 }
0x2381   :  { %v1898_v31 = vadd.f32 %v1896_v30, %v3445_v19 }
0x2383   :  { %3181 = vtanh.f32 %v1898_v31 }
0x238d   :  { %v3182_v32 = vpop.eup %3181 }
0x238e   :  { %1902 = vrot.lane.b32.xlu1 %v3182_v32, %s3219_s28 }
0x2400   :  { %v1903_v35 = vpop.permute.xlu1 %1902 }
0x2401   :  { %v1905_v37 = vmul.f32 %v1903_v35, %v1900_v33 }
0x2403   :  { %v1909_v38 = vadd.f32 %v1908_v36, %v1905_v37 }
0x2405   :  { %v1911_v39 = vrot.slane %v1909_v38, 6  ;;  %v3639_v40 = vsel %vm46_vm1, %v2347_v12, %v1909_v38 }
0x2407   :  { %1912 = vrot.lane.b32.xlu0 %v1911_v39, %s3219_s28 }
0x2479   :  { %v1913_v41 = vpop.permute.xlu0 %1912 }
0x247a   :  { %2865 = vmatmul.mubr.msk.f32.vlgmr.msra.gmra.mrb[14].mxu1 %vm616_vm11, %v1913_v41 }
0x247b   :  { %3032 = vmatpush3.bf16.msra.mxu1 %v3391_v51  ;;  %2886 = vmatprep.mubr.msk.f32.mxu1 %vm3217_vm10, %v3208_v1 }
0x247c   :  { %3033 = vmatprep.subr.bf16.mxu1 %v3215_v47 }
0x247f   :  { %3035 = vmatpush3.bf16.msra.mxu1 %v3401_v59 }
0x254d   :  { %v1982_v19 = vpop.f32.mrb[14].mxu1 }
0x254e   :  { %v1993_v42 = vadd.f32 %v1982_v19, %v3447_v20  ;;  %v2866_v43 = vpop.f32.mrb[15].mxu1  ;;  %v1986_v44 = vadd.f32 %v1982_v19, %v3443_v17 }
0x2550   :  { %1995 = vrot.lane.b32.xlu1 %v1993_v42, %s3218_s27  ;;  %v2548_v45 = vmul.f32 -1.442695, %v1986_v44 }
0x2552   :  { %3183 = vpow2.f32 %v2548_v45 }
0x255c   :  { %v3184_v46 = vpop.eup %3183 }
0x255d   :  { %v1990_v48 = vadd.f32 1.0, %v3184_v46 }
0x255f   :  { %3185 = vrcp.f32 %v1990_v48 }
0x2569   :  { %v3186_v49 = vpop.eup %3185 }
0x256a   :  { %v2005_v58 = vsub.f32 1.0, %v3186_v49  ;;  %v2012_v61 = vmul.f32 %v3186_v49, %v1911_v39 }
0x25c2   :  { %v1996_v50 = vpop.permute.xlu1 %1995 }
0x25c3   :  { %v1998_v54 = vmul.f32 %v3186_v49, %v1996_v50 }
0x25c5   :  { %2000 = vrot.lane.b32.xlu0 %v1998_v54, %s3218_s27 }
0x2637   :  { %v2001_v14 = vpop.permute.xlu0 %2000 }
0x2638   :  { %v2003_v56 = vadd.f32 %v2001_v14, %v3443_v17 }
0x263a   :  { %3187 = vtanh.f32 %v2003_v56 }
0x2644   :  { %v3188_v57 = vpop.eup %3187 }
0x2645   :  { %2007 = vrot.lane.b32.xlu1 %v3188_v57, %s3219_s28 }
0x26b7   :  { %v2008_v60 = vpop.permute.xlu1 %2007 }
0x26b8   :  { %v2010_v62 = vmul.f32 %v2008_v60, %v2005_v58 }
0x26ba   :  { %v3654_v63 = vadd.f32 %v2012_v61, %v2010_v62 }
0x26bc   :  { %2015 = vrot.lane.b32.xlu0 %v3654_v63, %s3219_s28  ;;  %v2118_v22 = vrot.slane %v3654_v63, 6 }
0x272e   :  { %v2016_v0 = vpop.permute.xlu0 %2015 }
0x272f   :  { %2876 = vmatmul.mubr.msk.f32.vlgmr.msra.gmra.mrb[24].mxu0 %vm616_vm11, %v2016_v0 }
0x2730   :  { %3038 = vmatpush3.bf16.msra.mxu0 %v3391_v51  ;;  %2897 = vmatprep.mubr.msk.f32.mxu0 %vm3217_vm10, %v3208_v1 }
0x2731   :  { %3039 = vmatprep.subr.bf16.mxu0 %v3215_v47 }
0x2734   :  { %3041 = vmatpush3.bf16.msra.mxu0 %v3401_v59 }
0x2802   :  { %v2085_v3 = vpop.f32.mrb[24].mxu0 }
0x2803   :  { %v2099_v24 = vadd.f32 %v2085_v3, %v3447_v20  ;;  %v2877_v4 = vpop.f32.mrb[25].mxu0  ;;  %v2090_v8 = vrot.slane %v2085_v3, 6 }
0x2805   :  { %v2101_v7 = vrot.slane %v2099_v24, 6  ;;  %v2092_v11 = vadd.f32 %v2090_v8, %v3443_v17 }
0x2807   :  { %2102 = vrot.lane.b32.xlu1 %v2101_v7, %s3218_s27  ;;  %v2550_v12 = vmul.f32 -1.442695, %v2092_v11 }
0x2809   :  { %3189 = vpow2.f32 %v2550_v12  ;;  %v28_v12 = vld [vmem:[%s3768_s1 + $0x88] sm:$0xff] }
0x2813   :  { %v3190_v51 = vpop.eup %3189 }
0x2814   :  { %v2096_v13 = vadd.f32 1.0, %v3190_v51  ;;  %v29_v51 = vld [vmem:[%s3768_s1 + $0x90] sm:$0xff] }
0x2816   :  { %3191 = vrcp.f32 %v2096_v13 }
0x2820   :  { %v3192_v1 = vpop.eup %3191 }
0x2821   :  { %v2112_v21 = vsub.f32 1.0, %v3192_v1  ;;  %v2120_v25 = vmul.f32 %v3192_v1, %v2118_v22  ;;  %v35_v22 = vld [vmem:[%s3768_s1 + $0xc0] sm:$0xf] }
0x2879   :  { %v2103_v15 = vpop.permute.xlu1 %2102 }
0x287a   :  { %v2105_v47 = vmul.f32 %v3192_v1, %v2103_v15  ;;  %v32_v1 = vld [vmem:[%s3768_s1 + $0xa8] sm:$0xff] }
0x287c   :  { %2107 = vrot.lane.b32.xlu0 %v2105_v47, %s3218_s27 }
0x28ee   :  { %v2108_v59 = vpop.permute.xlu0 %2107 }
0x28ef   :  { %v2110_v16 = vadd.f32 %v2108_v59, %v3443_v17 }
0x28f1   :  { %3193 = vtanh.f32 %v2110_v16  ;;  %v33_v16 = vld [vmem:[%s3768_s1 + $0xb0] sm:$0xff] }
0x28fb   :  { %v3194_v18 = vpop.eup %3193 }
0x28fc   :  { %2114 = vrot.lane.b32.xlu1 %v3194_v18, %s3219_s28  ;;  %v34_v18 = vld [vmem:[%s3768_s1 + $0xb8] sm:$0xff] }
0x296e   :  { %v2115_v23 = vpop.permute.xlu1 %2114 }
0x296f   :  { %v2117_v55 = vmul.f32 %v2115_v23, %v2112_v21  ;;  %v3054_v21 = vpack.c.bf16 %v34_v18, %v33_v16 }
0x2971   :  { %v2121_v26 = vadd.f32 %v2120_v25, %v2117_v55 }
0x2973   :  { %v2123_v27 = vrot.slane %v2121_v26, 2  ;;  %v2227_v45 = vrot.slane %v2121_v26, 6  ;;  %v2349_v54 = vsel %vm310_vm7, %v3654_v63, %v2121_v26 }
0x2975   :  { %2124 = vrot.lane.b32.xlu0 %v2123_v27, %s3219_s28 }
0x29e7   :  { %v2125_v28 = vpop.permute.xlu0 %2124 }
0x29e8   :  { %2887 = vmatmul.mubr.msk.f32.vlgmr.msra.gmra.mrb[16].mxu1 %vm616_vm11, %v2125_v28 }
0x2abb   :  { %v2194_v29 = vpop.f32.mrb[16].mxu1 }
0x2abc   :  { %v2208_v30 = vadd.f32 %v2194_v29, %v3447_v20  ;;  %v2888_v31 = vpop.f32.mrb[17].mxu1  ;;  %v2199_v33 = vrot.slane %v2194_v29, 4 }
0x2abe   :  { %v2210_v32 = vrot.slane %v2208_v30, 4  ;;  %v2201_v34 = vadd.f32 %v2199_v33, %v3443_v17 }
0x2ac0   :  { %2211 = vrot.lane.b32.xlu1 %v2210_v32, %s3218_s27  ;;  %v2552_v35 = vmul.f32 -1.442695, %v2201_v34 }
0x2ac2   :  { %3195 = vpow2.f32 %v2552_v35 }
0x2acc   :  { %v3196_v36 = vpop.eup %3195 }
0x2acd   :  { %v2205_v37 = vadd.f32 1.0, %v3196_v36 }
0x2acf   :  { %3197 = vrcp.f32 %v2205_v37 }
0x2ad9   :  { %v3198_v38 = vpop.eup %3197 }
0x2ada   :  { %v2221_v44 = vsub.f32 1.0, %v3198_v38  ;;  %v2229_v48 = vmul.f32 %v3198_v38, %v2227_v45 }
0x2b32   :  { %v2212_v39 = vpop.permute.xlu1 %2211 }
0x2b33   :  { %v2214_v41 = vmul.f32 %v3198_v38, %v2212_v39  ;;  %v2386_v38 = vsub.s32 4, %v3290_v53  ;;  %v3207_v39 = vld [vmem:[%s3768_s1 + $0xc8] sm:$0xff] }
0x2b35   :  { %2216 = vrot.lane.b32.xlu0 %v2214_v41, %s3218_s27  ;;  %v2387_v41 = vrot.slane %v3207_v39, %v2386_v38 }
0x2ba7   :  { %v2217_v19 = vpop.permute.xlu0 %2216 }
0x2ba8   :  { %v2219_v42 = vadd.f32 %v2217_v19, %v3443_v17 }
0x2baa   :  { %3199 = vtanh.f32 %v2219_v42 }
0x2bb4   :  { %v3200_v43 = vpop.eup %3199 }
0x2bb5   :  { %2223 = vrot.lane.b32.xlu1 %v3200_v43, %s3219_s28 }
0x2c27   :  { %v2224_v46 = vpop.permute.xlu1 %2223 }
0x2c28   :  { %v2226_v49 = vmul.f32 %v2224_v46, %v2221_v44 }
0x2c2a   :  { %v3679_v50 = vadd.f32 %v2229_v48, %v2226_v49 }
0x2c2c   :  { %v2232_v14 = vrot.slane %v3679_v50, 4  ;;  %v3686_v56 = vsel %vm75_vm0, %v2349_v54, %v3679_v50  ;;  %v2336_v55 = vrot.slane %v3679_v50, 6 }
0x2c2e   :  { %2233 = vrot.lane.b32.xlu0 %v2232_v14, %s3219_s28 }
0x2ca0   :  { %v2234_v57 = vpop.permute.xlu0 %2233 }
0x2ca1   :  { %2898 = vmatmul.mubr.msk.f32.vlgmr.msra.gmra.mrb[26].mxu0 %vm616_vm11, %v2234_v57 }
0x2d74   :  { %v2303_v58 = vpop.f32.mrb[26].mxu0 }
0x2d75   :  { %v2317_v60 = vadd.f32 %v2303_v58, %v3447_v20  ;;  %v2899_v61 = vpop.f32.mrb[27].mxu0  ;;  %v2308_v0 = vrot.slane %v2303_v58, 2  ;;  %v27_v20 = vld [vmem:[%s3768_s1 + $0x80] sm:$0xff] }
0x2d76   :  { %v3042_v13 = vpack.c.bf16 %v28_v12, %v27_v20 }
0x2d77   :  { %v2319_v62 = vrot.slane %v2317_v60, 2  ;;  %v2310_v63 = vadd.f32 %v2308_v0, %v3443_v17 }
0x2d78   :  { %3043 = vmatprep.subr.bf16.mxu1 %v3042_v13 }
0x2d79   :  { %2320 = vrot.lane.b32.xlu1 %v2319_v62, %s3218_s27  ;;  %v2554_v3 = vmul.f32 -1.442695, %v2310_v63  ;;  %3045 = vmatpush3.bf16.msra.mxu1 %v3042_v13 }
0x2d7b   :  { %3201 = vpow2.f32 %v2554_v3 }
0x2d85   :  { %v3202_v24 = vpop.eup %3201 }
0x2d86   :  { %v2314_v4 = vadd.f32 1.0, %v3202_v24 }
0x2d88   :  { %3203 = vrcp.f32 %v2314_v4 }
0x2d92   :  { %v3204_v7 = vpop.eup %3203 }
0x2d93   :  { %v2330_v23 = vsub.f32 1.0, %v3204_v7  ;;  %v2338_v27 = vmul.f32 %v3204_v7, %v2336_v55 }
0x2deb   :  { %v2321_v8 = vpop.permute.xlu1 %2320 }
0x2dec   :  { %v2323_v11 = vmul.f32 %v3204_v7, %v2321_v8 }
0x2dee   :  { %2325 = vrot.lane.b32.xlu0 %v2323_v11, %s3218_s27 }
0x2df2   :  { %2356 = vrot.lane.b32.xlu0 %v3507_v2, %s3219_s28  ;;  %v30_v2 = vld [vmem:[%s3768_s1 + $0x98] sm:$0xff] }
0x2df6   :  { %2358 = vrot.lane.b32.xlu0 %v3573_v52, %s3219_s28  ;;  %v3046_v52 = vpack.c.bf16 %v30_v2, %v29_v51 }
0x2df8   :  { %3047 = vmatprep.subr.bf16.mxu1 %v3046_v52 }
0x2df9   :  { %3049 = vmatpush3.bf16.msra.mxu1 %v3046_v52 }
0x2dfa   :  { %2360 = vrot.lane.b32.xlu0 %v3639_v40, %s3219_s28  ;;  %v31_v40 = vld [vmem:[%s3768_s1 + $0xa0] sm:$0xff] }
0x2dfb   :  { %v3050_v15 = vpack.c.bf16 %v32_v1, %v31_v40 }
0x2dfd   :  { %3051 = vmatprep.subr.bf16.mxu1 %v3050_v15 }
0x2dfe   :  { %3053 = vmatpush3.bf16.msra.mxu1 %v3050_v15 }
0x2dff   :  { %3055 = vmatprep.subr.bf16.mxu1 %v3054_v21 }
0x2e02   :  { %3057 = vmatpush3.bf16.msra.mxu1 %v3054_v21 }
0x2e03   :  { %2916 = vmatprep.subr.msk.mxu1 %vm75_vm0, %v35_v22 }
0x2e06   :  { %2917 = vmatpush3.msk.msra.mxu1 %vm75_vm0, %v35_v22 }
0x2e60   :  { %v2326_v47 = vpop.permute.xlu0 %2325 }
0x2e61   :  { %v2328_v59 = vadd.f32 %v2326_v47, %v3443_v17 }
0x2e63   :  { %3205 = vtanh.f32 %v2328_v59 }
0x2e64   :  { %v2357_v25 = vpop.permute.xlu0 %2356 }
0x2e6d   :  { %v3206_v17 = vpop.eup %3205 }
0x2e6e   :  { %2332 = vrot.lane.b32.xlu1 %v3206_v17, %s3219_s28 }
0x2e72   :  { %2368 = vrot.lane.b32.xlu1 %v3410_v5, %s3220_s19 }
0x2e76   :  { %2370 = vrot.lane.b32.xlu1 %v3412_v6, %s3220_s19  ;;  %v2359_v6 = vpop.permute.xlu0 %2358 }
0x2e7a   :  { %2372 = vrot.lane.b32.xlu1 %v3420_v9, %s3220_s19  ;;  %v2361_v32 = vpop.permute.xlu0 %2360 }
0x2e7e   :  { %2374 = vrot.lane.b32.xlu1 %v3423_v10, %s3220_s19 }
0x2ee0   :  { %v2333_v26 = vpop.permute.xlu1 %2332 }
0x2ee1   :  { %v2335_v28 = vmul.f32 %v2333_v26, %v2330_v23 }
0x2ee3   :  { %v2339_v29 = vadd.f32 %v2338_v27, %v2335_v28 }
0x2ee4   :  { %v2369_v30 = vpop.permute.xlu1 %2368 }
0x2ee5   :  { %v2380_v31 = vsel %vm616_vm11, %v2357_v25, %v2369_v30  ;;  %v2351_v5 = vsel %vm46_vm1, %v3686_v56, %v2339_v29 }
0x2ee6   :  { %2362 = vrot.lane.b32.xlu0 %v2351_v5, %s3219_s28  ;;  %2918 = vmatprep.mubr.msk.f32.mxu1 %vm2388_vm12, %v2380_v31 }
0x2ee8   :  { %v2371_v9 = vpop.permute.xlu1 %2370 }
0x2ee9   :  { %v2381_v10 = vsel %vm616_vm11, %v2359_v6, %v2371_v9 }
0x2eea   :  { %2919 = vmatmul.mubr.msk.f32.vlgmr.msra.gmra.mrb[18].mxu1 %vm2388_vm12, %v2381_v10 }
0x2eec   :  { %v2373_v33 = vpop.permute.xlu1 %2372 }
0x2eed   :  { %v2382_v34 = vsel %vm616_vm11, %v2361_v32, %v2373_v33 }
0x2eee   :  { %2921 = vmatprep.mubr.msk.f32.mxu1 %vm2388_vm12, %v2382_v34 }
0x2ef0   :  { %v2375_v35 = vpop.permute.xlu1 %2374 }
0x2f58   :  { %v2363_v36 = vpop.permute.xlu0 %2362 }
0x2f59   :  { %v2383_v37 = vsel %vm616_vm11, %v2363_v36, %v2375_v35 }
0x2f5a   :  { %2922 = vmatmul.mubr.msk.f32.gmra.mrb[20].mxu1 %vm2388_vm12, %v2383_v37 }
0x2fbd   :  { %v2920_v19 = vpop.f32.mrb[18].mxu1 }
0x2fbe   :  { %v2476_v42 = vadd.f32 %v2920_v19, %v2387_v41  ;;  %v2470_v43 = vpop.f32.mrb[19].mxu1 }
0x2fbf   :  { %v2471_v44 = vadd.f32 %v2470_v43, %v2387_v41 }
0x2fc0   :  { %2490 = vst.msk [vmem:[%s3769_s2 + $0x8] sm:$0xff] %vm111_vm5, %v2476_v42 }
0x2fc1   :  { %2489 = vst.msk [vmem:[%s3769_s2] sm:$0xff] %vm111_vm5, %v2471_v44 }
0x302d   :  { %v2923_v53 = vpop.f32.mrb[20].mxu1 }
0x302e   :  { %v2486_v45 = vadd.f32 %v2923_v53, %v2387_v41  ;;  %v2480_v46 = vpop.f32.mrb[21].mxu1 }
0x302f   :  { %v2481_v48 = vadd.f32 %v2480_v46, %v2387_v41 }
0x3030   :  { %2492 = vst.msk [vmem:[%s3769_s2 + $0x18] sm:$0xff] %vm111_vm5, %v2486_v45 }
0x3031   :  { %2491 = vst.msk [vmem:[%s3769_s2 + $0x10] sm:$0xff] %vm111_vm5, %v2481_v48 }

</bundles_post_ra>
